<compile_context>
chip_gen: v7x
topology: tpu7x:2x2x1
jax: 0.10.0
libtpu: 0.0.40
codegen_flags: <defaults>
</compile_context>

<pallas_src>
import jax
import jax.numpy as jnp
from jax.experimental import pallas as pl
from jax.experimental.pallas import tpu as pltpu

EPS = 1e-5
UP = 2  # upscale_factor hard-coded to 2 in the PyTorch module


def _shift_h(a, dh):
    """s[..., i, :] = a[..., i+dh, :], zero-filled where i+dh falls outside."""
    if dh == 0:
        return a
    if dh > 0:
        return jnp.concatenate(
            [a[..., dh:, :], jnp.zeros_like(a[..., :dh, :])], axis=-2)
    return jnp.concatenate(
        [jnp.zeros_like(a[..., dh:, :]), a[..., :dh, :]], axis=-2)


def _shift_w(a, dw):
    """s[..., j] = a[..., j+dw], zero-filled where j+dw falls outside."""
    if dw == 0:
        return a
    if dw > 0:
        return jnp.concatenate(
            [a[..., dw:], jnp.zeros_like(a[..., :dw])], axis=-1)
    return jnp.concatenate(
        [jnp.zeros_like(a[..., dw:]), a[..., :dw]], axis=-1)


def _upsampling_norm_kernel(w_ref, b_ref, x_ref, lr_ref, o_ref):
    # w_ref : SMEM f32[C*9]            conv weights, flat index c*9 + kh*3 + kw
    # b_ref : SMEM f32[1]              conv bias
    # x_ref : VMEM f32[NB, C, H, W]    feature-map block (NB batch images)
    # lr_ref: VMEM f32[NB, H/2, W/2]   low-res density block (channel squeezed)
    # o_ref : VMEM f32[NB, H, W]       output block (channel squeezed)
    NB, C, H, W = x_ref.shape

    x = x_ref[...]   # single load of the block; everything below is registers

    # ---- 3x3 conv (C_in -> 1) + bias + ReLU.
    # Per channel: build the 3 lane-shifted, zero-edge-filled copies once and
    # reuse them across the 3 sublane shifts -> 9*C shifted MACs on the VPU.
    # TODO(synk): for large C switch the channel loop to lax.fori_loop (and
    # tile H, W) to bound vreg pressure; fully unrolled is fine at C=4, 16x16.
    acc = jnp.zeros((NB, H, W), jnp.float32)
    for c in range(C):
        cols = [_shift_w(x[:, c], dw) for dw in (-1, 0, 1)]   # reused 3x each
        for kh in range(3):
            for kw in range(3):
                term = _shift_h(cols[kw], kh - 1)             # x[c, i+kh-1, j+kw-1]
                acc = acc + term * w_ref[c * 9 + kh * 3 + kw]
    y = jnp.maximum(acc + b_ref[0], 0.0)

    # ---- N2_Normalization denominator: per-2x2-block sum of y replicated back
    # to full resolution (== nearest_up(avgpool2(y) * 4)).  Shifted copies plus
    # row/column parity selects; shifted-in zeros only land in positions the
    # parity select discards (H, W even), so no scratch / halo is needed.
    row_even = jax.lax.broadcasted_iota(jnp.int32, (H, W), 0) % UP == 0
    col_even = jax.lax.broadcasted_iota(jnp.int32, (H, W), 1) % UP == 0

    rowsum = y + jnp.where(row_even, _shift_h(y, 1), _shift_h(y, -1))
    block_sum = rowsum + jnp.where(col_even, _shift_w(rowsum, 1),
                                   _shift_w(rowsum, -1))

    # Exact f32 divide (tiny divide count; approx reciprocal risks 1e-4 tol).
    den = y / (block_sum + EPS)

    # ---- Recover_from_density: nearest x2 upsample of lr, exact f32, no MXU.
    # lr_up[n, i, j] == lr[n, i//2, j//2]; built from static slices +
    # concatenate (pure register/XLU data movement, VPU/EUP untouched).
    # TODO(synk): at production H, W replace the O(H+W) slice/concat chain with
    # a strided-DMA or band-tiled replication.
    lrr = lr_ref[...]                                          # (NB, H/2, W/2)
    lr_rows = jnp.concatenate(
        [lrr[:, i // UP:i // UP + 1, :] for i in range(H)], axis=1)      # (NB, H, W/2)
    lr_up = jnp.concatenate(
        [lr_rows[:, :, j // UP:j // UP + 1] for j in range(W)], axis=2)  # (NB, H, W)

    o_ref[...] = (den * lr_up).astype(o_ref.dtype)


def upsampling_norm(feature_map, lr, w, b, *, batch_block=None):
    """feature_map: (N, C, H, W) f32; lr: (N, 1, H//2, W//2) f32;
    w: (1, C, 3, 3) conv weight (OIHW); b: (1,) conv bias."""
    N, C, H, W = feature_map.shape
    assert H % UP == 0 and W % UP == 0
    Hh, Wh = H // UP, W // UP
    assert lr.shape == (N, 1, Hh, Wh)

    if batch_block is None:
        # At most two grid steps: amortizes the ~0.35us fixed per-step cost and
        # still gives dimension_semantics=("parallel",) two steps to split
        # across the v7x TensorCore pair (v5e/v6e run them back to back).
        batch_block = N // 2 if (N % 2 == 0 and N > 1) else 1
    assert N % batch_block == 0
    grid = (N // batch_block,)

    w_flat = w.reshape(-1).astype(jnp.float32)                 # (C*9,)
    b_flat = b.reshape(-1).astype(jnp.float32)                 # (1,)

    # TODO(synk): at W=16 only 16/128 lanes are active per vector op / store;
    # for production shapes tile so the stored minor dim is a multiple of 128
    # (or pack batch/spatial along the lane axis) for lane-dense vst.
    out = pl.pallas_call(
        _upsampling_norm_kernel,
        out_shape=jax.ShapeDtypeStruct((N, 1, H, W), jnp.float32),
        grid=grid,
        in_specs=[
            pl.BlockSpec(memory_space=pltpu.MemorySpace.SMEM),              # w
            pl.BlockSpec(memory_space=pltpu.MemorySpace.SMEM),              # b
            pl.BlockSpec((batch_block, C, H, W), lambda g: (g, 0, 0, 0)),   # feature_map
            pl.BlockSpec((batch_block, None, Hh, Wh),
                         lambda g: (g, 0, 0, 0)),                           # lr (channel squeezed)
        ],
        out_specs=pl.BlockSpec((batch_block, None, H, W),
                               lambda g: (g, 0, 0, 0)),
        compiler_params=pltpu.CompilerParams(
            dimension_semantics=("parallel",),
            vmem_limit_bytes=32 * 1024 * 1024),
    )(w_flat, b_flat, feature_map.astype(jnp.float32), lr.astype(jnp.float32))
    return out


def upsampling_norm_ref(feature_map, lr, w, b):
    """Pure-JAX reference of the PyTorch forward."""
    y = jax.lax.conv_general_dilated(
        feature_map, w, window_strides=(1, 1), padding=((1, 1), (1, 1)),
        dimension_numbers=("NCHW", "OIHW", "NCHW"))
    y = jnp.maximum(y + b.reshape(1, -1, 1, 1), 0.0)
    N, _, H, W = y.shape
    pooled = y.reshape(N, 1, H // UP, UP, W // UP, UP).sum(axis=(3, 5))
    ups = jnp.repeat(jnp.repeat(pooled, UP, axis=2), UP, axis=3)
    den = y / (ups + EPS)
    lr_up = jnp.repeat(jnp.repeat(lr, UP, axis=2), UP, axis=3)
    return den * lr_up


if __name__ == "__main__":
    N, C, H, W = 2, 4, 16, 16

    k_fm, k_lr = jax.random.split(jax.random.PRNGKey(0))
    feature_map = jax.random.normal(k_fm, (N, C, H, W), jnp.float32)
    lr = jax.random.uniform(k_lr, (N, 1, H // UP, W // UP), jnp.float32)

    # Deterministic synthetic conv parameters (Conv2d(C, 1, 3, 1, 1)).
    k_w, k_b = jax.random.split(jax.random.PRNGKey(42))
    fan_in = C * 3 * 3
    bound = 1.0 / (fan_in ** 0.5)
    conv_w = jax.random.uniform(k_w, (1, C, 3, 3), jnp.float32, -bound, bound)
    conv_b = jax.random.uniform(k_b, (1,), jnp.float32, -bound, bound)

    out = upsampling_norm(feature_map, lr, conv_w, conv_b)
    out = jax.block_until_ready(out)

    ref = upsampling_norm_ref(feature_map, lr, conv_w, conv_b)
    assert out.shape == (N, 1, H, W)
    assert jnp.allclose(out, ref, atol=1e-4, rtol=1e-4)

    print("KERNEL_OK")
</pallas_src>

<mosaic_0001>
module attributes {stable_mosaic.version = 11 : i64} {
  func.func @_upsampling_norm_kernel(%arg0: i32, %arg1: memref<36xf32, #tpu.memory_space<smem>>, %arg2: memref<1xf32, #tpu.memory_space<smem>>, %arg3: memref<1x4x16x16xf32, #tpu.memory_space<vmem>>, %arg4: memref<1x1x8x8xf32, #tpu.memory_space<vmem>>, %arg5: memref<1x1x16x16xf32, #tpu.memory_space<vmem>>) attributes {dimension_semantics = [#tpu.dimension_semantics<parallel>], iteration_bounds = array<i64: 2>, scalar_prefetch = 0 : i64, scratch_operands = 0 : i64, tpu.core_type = #tpu.core_type<tc>, window_params = [{transform_indices = @transform_0, window_bounds = array<i64: 36>}, {transform_indices = @transform_1, window_bounds = array<i64: 1>}, {transform_indices = @transform_2, window_bounds = array<i64: 1, 4, 16, 16>}, {transform_indices = @transform_3, window_bounds = array<i64: 1, 1, 8, 8>}, {transform_indices = @transform_4, window_bounds = array<i64: 1, 1, 16, 16>}]} {
    %c0 = arith.constant 0 : index
    %c0_0 = arith.constant 0 : index
    %c0_1 = arith.constant 0 : index
    %c0_2 = arith.constant 0 : index
    %0 = vector.load %arg3[%c0, %c0_0, %c0_1, %c0_2] : memref<1x4x16x16xf32, #tpu.memory_space<vmem>>, vector<1x4x16x16xf32>
    %cst = arith.constant 0.000000e+00 : f32
    %1 = vector.broadcast %cst : f32 to vector<1x16x16xf32>
    %2 = vector.extract_strided_slice %0 {offsets = [0, 0, 0, 0], sizes = [1, 1, 16, 16], strides = [1, 1, 1, 1]} : vector<1x4x16x16xf32> to vector<1x1x16x16xf32>
    %3 = vector.shape_cast %2 : vector<1x1x16x16xf32> to vector<1x16x16xf32>
    %cst_3 = arith.constant 0.000000e+00 : f32
    %4 = vector.broadcast %cst_3 : f32 to vector<1x16x1xf32>
    %5 = vector.extract_strided_slice %3 {offsets = [0, 0, 0], sizes = [1, 16, 15], strides = [1, 1, 1]} : vector<1x16x16xf32> to vector<1x16x15xf32>
    %6 = tpu.concatenate %4, %5 in 2 : vector<1x16x1xf32>, vector<1x16x15xf32> -> vector<1x16x16xf32>
    %7 = vector.extract_strided_slice %0 {offsets = [0, 0, 0, 0], sizes = [1, 1, 16, 16], strides = [1, 1, 1, 1]} : vector<1x4x16x16xf32> to vector<1x1x16x16xf32>
    %8 = vector.shape_cast %7 : vector<1x1x16x16xf32> to vector<1x16x16xf32>
    %9 = vector.extract_strided_slice %0 {offsets = [0, 0, 0, 0], sizes = [1, 1, 16, 16], strides = [1, 1, 1, 1]} : vector<1x4x16x16xf32> to vector<1x1x16x16xf32>
    %10 = vector.shape_cast %9 : vector<1x1x16x16xf32> to vector<1x16x16xf32>
    %11 = vector.extract_strided_slice %10 {offsets = [0, 0, 1], sizes = [1, 16, 15], strides = [1, 1, 1]} : vector<1x16x16xf32> to vector<1x16x15xf32>
    %cst_4 = arith.constant 0.000000e+00 : f32
    %12 = vector.broadcast %cst_4 : f32 to vector<1x16x1xf32>
    %13 = tpu.concatenate %11, %12 in 2 : vector<1x16x15xf32>, vector<1x16x1xf32> -> vector<1x16x16xf32>
    %cst_5 = arith.constant 0.000000e+00 : f32
    %14 = vector.broadcast %cst_5 : f32 to vector<1x1x16xf32>
    %15 = vector.extract_strided_slice %6 {offsets = [0, 0, 0], sizes = [1, 15, 16], strides = [1, 1, 1]} : vector<1x16x16xf32> to vector<1x15x16xf32>
    %16 = tpu.concatenate %14, %15 in 1 : vector<1x1x16xf32>, vector<1x15x16xf32> -> vector<1x16x16xf32>
    %c0_6 = arith.constant 0 : index
    %17 = memref.load %arg1[%c0_6] : memref<36xf32, #tpu.memory_space<smem>>
    %18 = vector.broadcast %17 : f32 to vector<1x16x16xf32>
    %19 = arith.mulf %16, %18 : vector<1x16x16xf32>
    %20 = arith.addf %1, %19 : vector<1x16x16xf32>
    %cst_7 = arith.constant 0.000000e+00 : f32
    %21 = vector.broadcast %cst_7 : f32 to vector<1x1x16xf32>
    %22 = vector.extract_strided_slice %8 {offsets = [0, 0, 0], sizes = [1, 15, 16], strides = [1, 1, 1]} : vector<1x16x16xf32> to vector<1x15x16xf32>
    %23 = tpu.concatenate %21, %22 in 1 : vector<1x1x16xf32>, vector<1x15x16xf32> -> vector<1x16x16xf32>
    %c1 = arith.constant 1 : index
    %24 = memref.load %arg1[%c1] : memref<36xf32, #tpu.memory_space<smem>>
    %25 = vector.broadcast %24 : f32 to vector<1x16x16xf32>
    %26 = arith.mulf %23, %25 : vector<1x16x16xf32>
    %27 = arith.addf %20, %26 : vector<1x16x16xf32>
    %cst_8 = arith.constant 0.000000e+00 : f32
    %28 = vector.broadcast %cst_8 : f32 to vector<1x1x16xf32>
    %29 = vector.extract_strided_slice %13 {offsets = [0, 0, 0], sizes = [1, 15, 16], strides = [1, 1, 1]} : vector<1x16x16xf32> to vector<1x15x16xf32>
    %30 = tpu.concatenate %28, %29 in 1 : vector<1x1x16xf32>, vector<1x15x16xf32> -> vector<1x16x16xf32>
    %c2 = arith.constant 2 : index
    %31 = memref.load %arg1[%c2] : memref<36xf32, #tpu.memory_space<smem>>
    %32 = vector.broadcast %31 : f32 to vector<1x16x16xf32>
    %33 = arith.mulf %30, %32 : vector<1x16x16xf32>
    %34 = arith.addf %27, %33 : vector<1x16x16xf32>
    %c3 = arith.constant 3 : index
    %35 = memref.load %arg1[%c3] : memref<36xf32, #tpu.memory_space<smem>>
    %36 = vector.broadcast %35 : f32 to vector<1x16x16xf32>
    %37 = arith.mulf %6, %36 : vector<1x16x16xf32>
    %38 = arith.addf %34, %37 : vector<1x16x16xf32>
    %c4 = arith.constant 4 : index
    %39 = memref.load %arg1[%c4] : memref<36xf32, #tpu.memory_space<smem>>
    %40 = vector.broadcast %39 : f32 to vector<1x16x16xf32>
    %41 = arith.mulf %8, %40 : vector<1x16x16xf32>
    %42 = arith.addf %38, %41 : vector<1x16x16xf32>
    %c5 = arith.constant 5 : index
    %43 = memref.load %arg1[%c5] : memref<36xf32, #tpu.memory_space<smem>>
    %44 = vector.broadcast %43 : f32 to vector<1x16x16xf32>
    %45 = arith.mulf %13, %44 : vector<1x16x16xf32>
    %46 = arith.addf %42, %45 : vector<1x16x16xf32>
    %47 = vector.extract_strided_slice %6 {offsets = [0, 1, 0], sizes = [1, 15, 16], strides = [1, 1, 1]} : vector<1x16x16xf32> to vector<1x15x16xf32>
    %cst_9 = arith.constant 0.000000e+00 : f32
    %48 = vector.broadcast %cst_9 : f32 to vector<1x1x16xf32>
    %49 = tpu.concatenate %47, %48 in 1 : vector<1x15x16xf32>, vector<1x1x16xf32> -> vector<1x16x16xf32>
    %c6 = arith.constant 6 : index
    %50 = memref.load %arg1[%c6] : memref<36xf32, #tpu.memory_space<smem>>
    %51 = vector.broadcast %50 : f32 to vector<1x16x16xf32>
    %52 = arith.mulf %49, %51 : vector<1x16x16xf32>
    %53 = arith.addf %46, %52 : vector<1x16x16xf32>
    %54 = vector.extract_strided_slice %8 {offsets = [0, 1, 0], sizes = [1, 15, 16], strides = [1, 1, 1]} : vector<1x16x16xf32> to vector<1x15x16xf32>
    %cst_10 = arith.constant 0.000000e+00 : f32
    %55 = vector.broadcast %cst_10 : f32 to vector<1x1x16xf32>
    %56 = tpu.concatenate %54, %55 in 1 : vector<1x15x16xf32>, vector<1x1x16xf32> -> vector<1x16x16xf32>
    %c7 = arith.constant 7 : index
    %57 = memref.load %arg1[%c7] : memref<36xf32, #tpu.memory_space<smem>>
    %58 = vector.broadcast %57 : f32 to vector<1x16x16xf32>
    %59 = arith.mulf %56, %58 : vector<1x16x16xf32>
    %60 = arith.addf %53, %59 : vector<1x16x16xf32>
    %61 = vector.extract_strided_slice %13 {offsets = [0, 1, 0], sizes = [1, 15, 16], strides = [1, 1, 1]} : vector<1x16x16xf32> to vector<1x15x16xf32>
    %cst_11 = arith.constant 0.000000e+00 : f32
    %62 = vector.broadcast %cst_11 : f32 to vector<1x1x16xf32>
    %63 = tpu.concatenate %61, %62 in 1 : vector<1x15x16xf32>, vector<1x1x16xf32> -> vector<1x16x16xf32>
    %c8 = arith.constant 8 : index
    %64 = memref.load %arg1[%c8] : memref<36xf32, #tpu.memory_space<smem>>
    %65 = vector.broadcast %64 : f32 to vector<1x16x16xf32>
    %66 = arith.mulf %63, %65 : vector<1x16x16xf32>
    %67 = arith.addf %60, %66 : vector<1x16x16xf32>
    %68 = vector.extract_strided_slice %0 {offsets = [0, 1, 0, 0], sizes = [1, 1, 16, 16], strides = [1, 1, 1, 1]} : vector<1x4x16x16xf32> to vector<1x1x16x16xf32>
    %69 = vector.shape_cast %68 : vector<1x1x16x16xf32> to vector<1x16x16xf32>
    %cst_12 = arith.constant 0.000000e+00 : f32
    %70 = vector.broadcast %cst_12 : f32 to vector<1x16x1xf32>
    %71 = vector.extract_strided_slice %69 {offsets = [0, 0, 0], sizes = [1, 16, 15], strides = [1, 1, 1]} : vector<1x16x16xf32> to vector<1x16x15xf32>
    %72 = tpu.concatenate %70, %71 in 2 : vector<1x16x1xf32>, vector<1x16x15xf32> -> vector<1x16x16xf32>
    %73 = vector.extract_strided_slice %0 {offsets = [0, 1, 0, 0], sizes = [1, 1, 16, 16], strides = [1, 1, 1, 1]} : vector<1x4x16x16xf32> to vector<1x1x16x16xf32>
    %74 = vector.shape_cast %73 : vector<1x1x16x16xf32> to vector<1x16x16xf32>
    %75 = vector.extract_strided_slice %0 {offsets = [0, 1, 0, 0], sizes = [1, 1, 16, 16], strides = [1, 1, 1, 1]} : vector<1x4x16x16xf32> to vector<1x1x16x16xf32>
    %76 = vector.shape_cast %75 : vector<1x1x16x16xf32> to vector<1x16x16xf32>
    %77 = vector.extract_strided_slice %76 {offsets = [0, 0, 1], sizes = [1, 16, 15], strides = [1, 1, 1]} : vector<1x16x16xf32> to vector<1x16x15xf32>
    %cst_13 = arith.constant 0.000000e+00 : f32
    %78 = vector.broadcast %cst_13 : f32 to vector<1x16x1xf32>
    %79 = tpu.concatenate %77, %78 in 2 : vector<1x16x15xf32>, vector<1x16x1xf32> -> vector<1x16x16xf32>
    %cst_14 = arith.constant 0.000000e+00 : f32
    %80 = vector.broadcast %cst_14 : f32 to vector<1x1x16xf32>
    %81 = vector.extract_strided_slice %72 {offsets = [0, 0, 0], sizes = [1, 15, 16], strides = [1, 1, 1]} : vector<1x16x16xf32> to vector<1x15x16xf32>
    %82 = tpu.concatenate %80, %81 in 1 : vector<1x1x16xf32>, vector<1x15x16xf32> -> vector<1x16x16xf32>
    %c9 = arith.constant 9 : index
    %83 = memref.load %arg1[%c9] : memref<36xf32, #tpu.memory_space<smem>>
    %84 = vector.broadcast %83 : f32 to vector<1x16x16xf32>
    %85 = arith.mulf %82, %84 : vector<1x16x16xf32>
    %86 = arith.addf %67, %85 : vector<1x16x16xf32>
    %cst_15 = arith.constant 0.000000e+00 : f32
    %87 = vector.broadcast %cst_15 : f32 to vector<1x1x16xf32>
    %88 = vector.extract_strided_slice %74 {offsets = [0, 0, 0], sizes = [1, 15, 16], strides = [1, 1, 1]} : vector<1x16x16xf32> to vector<1x15x16xf32>
    %89 = tpu.concatenate %87, %88 in 1 : vector<1x1x16xf32>, vector<1x15x16xf32> -> vector<1x16x16xf32>
    %c10 = arith.constant 10 : index
    %90 = memref.load %arg1[%c10] : memref<36xf32, #tpu.memory_space<smem>>
    %91 = vector.broadcast %90 : f32 to vector<1x16x16xf32>
    %92 = arith.mulf %89, %91 : vector<1x16x16xf32>
    %93 = arith.addf %86, %92 : vector<1x16x16xf32>
    %cst_16 = arith.constant 0.000000e+00 : f32
    %94 = vector.broadcast %cst_16 : f32 to vector<1x1x16xf32>
    %95 = vector.extract_strided_slice %79 {offsets = [0, 0, 0], sizes = [1, 15, 16], strides = [1, 1, 1]} : vector<1x16x16xf32> to vector<1x15x16xf32>
    %96 = tpu.concatenate %94, %95 in 1 : vector<1x1x16xf32>, vector<1x15x16xf32> -> vector<1x16x16xf32>
    %c11 = arith.constant 11 : index
    %97 = memref.load %arg1[%c11] : memref<36xf32, #tpu.memory_space<smem>>
    %98 = vector.broadcast %97 : f32 to vector<1x16x16xf32>
    %99 = arith.mulf %96, %98 : vector<1x16x16xf32>
    %100 = arith.addf %93, %99 : vector<1x16x16xf32>
    %c12 = arith.constant 12 : index
    %101 = memref.load %arg1[%c12] : memref<36xf32, #tpu.memory_space<smem>>
    %102 = vector.broadcast %101 : f32 to vector<1x16x16xf32>
    %103 = arith.mulf %72, %102 : vector<1x16x16xf32>
    %104 = arith.addf %100, %103 : vector<1x16x16xf32>
    %c13 = arith.constant 13 : index
    %105 = memref.load %arg1[%c13] : memref<36xf32, #tpu.memory_space<smem>>
    %106 = vector.broadcast %105 : f32 to vector<1x16x16xf32>
    %107 = arith.mulf %74, %106 : vector<1x16x16xf32>
    %108 = arith.addf %104, %107 : vector<1x16x16xf32>
    %c14 = arith.constant 14 : index
    %109 = memref.load %arg1[%c14] : memref<36xf32, #tpu.memory_space<smem>>
    %110 = vector.broadcast %109 : f32 to vector<1x16x16xf32>
    %111 = arith.mulf %79, %110 : vector<1x16x16xf32>
    %112 = arith.addf %108, %111 : vector<1x16x16xf32>
    %113 = vector.extract_strided_slice %72 {offsets = [0, 1, 0], sizes = [1, 15, 16], strides = [1, 1, 1]} : vector<1x16x16xf32> to vector<1x15x16xf32>
    %cst_17 = arith.constant 0.000000e+00 : f32
    %114 = vector.broadcast %cst_17 : f32 to vector<1x1x16xf32>
    %115 = tpu.concatenate %113, %114 in 1 : vector<1x15x16xf32>, vector<1x1x16xf32> -> vector<1x16x16xf32>
    %c15 = arith.constant 15 : index
    %116 = memref.load %arg1[%c15] : memref<36xf32, #tpu.memory_space<smem>>
    %117 = vector.broadcast %116 : f32 to vector<1x16x16xf32>
    %118 = arith.mulf %115, %117 : vector<1x16x16xf32>
    %119 = arith.addf %112, %118 : vector<1x16x16xf32>
    %120 = vector.extract_strided_slice %74 {offsets = [0, 1, 0], sizes = [1, 15, 16], strides = [1, 1, 1]} : vector<1x16x16xf32> to vector<1x15x16xf32>
    %cst_18 = arith.constant 0.000000e+00 : f32
    %121 = vector.broadcast %cst_18 : f32 to vector<1x1x16xf32>
    %122 = tpu.concatenate %120, %121 in 1 : vector<1x15x16xf32>, vector<1x1x16xf32> -> vector<1x16x16xf32>
    %c16 = arith.constant 16 : index
    %123 = memref.load %arg1[%c16] : memref<36xf32, #tpu.memory_space<smem>>
    %124 = vector.broadcast %123 : f32 to vector<1x16x16xf32>
    %125 = arith.mulf %122, %124 : vector<1x16x16xf32>
    %126 = arith.addf %119, %125 : vector<1x16x16xf32>
    %127 = vector.extract_strided_slice %79 {offsets = [0, 1, 0], sizes = [1, 15, 16], strides = [1, 1, 1]} : vector<1x16x16xf32> to vector<1x15x16xf32>
    %cst_19 = arith.constant 0.000000e+00 : f32
    %128 = vector.broadcast %cst_19 : f32 to vector<1x1x16xf32>
    %129 = tpu.concatenate %127, %128 in 1 : vector<1x15x16xf32>, vector<1x1x16xf32> -> vector<1x16x16xf32>
    %c17 = arith.constant 17 : index
    %130 = memref.load %arg1[%c17] : memref<36xf32, #tpu.memory_space<smem>>
    %131 = vector.broadcast %130 : f32 to vector<1x16x16xf32>
    %132 = arith.mulf %129, %131 : vector<1x16x16xf32>
    %133 = arith.addf %126, %132 : vector<1x16x16xf32>
    %134 = vector.extract_strided_slice %0 {offsets = [0, 2, 0, 0], sizes = [1, 1, 16, 16], strides = [1, 1, 1, 1]} : vector<1x4x16x16xf32> to vector<1x1x16x16xf32>
    %135 = vector.shape_cast %134 : vector<1x1x16x16xf32> to vector<1x16x16xf32>
    %cst_20 = arith.constant 0.000000e+00 : f32
    %136 = vector.broadcast %cst_20 : f32 to vector<1x16x1xf32>
    %137 = vector.extract_strided_slice %135 {offsets = [0, 0, 0], sizes = [1, 16, 15], strides = [1, 1, 1]} : vector<1x16x16xf32> to vector<1x16x15xf32>
    %138 = tpu.concatenate %136, %137 in 2 : vector<1x16x1xf32>, vector<1x16x15xf32> -> vector<1x16x16xf32>
    %139 = vector.extract_strided_slice %0 {offsets = [0, 2, 0, 0], sizes = [1, 1, 16, 16], strides = [1, 1, 1, 1]} : vector<1x4x16x16xf32> to vector<1x1x16x16xf32>
    %140 = vector.shape_cast %139 : vector<1x1x16x16xf32> to vector<1x16x16xf32>
    %141 = vector.extract_strided_slice %0 {offsets = [0, 2, 0, 0], sizes = [1, 1, 16, 16], strides = [1, 1, 1, 1]} : vector<1x4x16x16xf32> to vector<1x1x16x16xf32>
    %142 = vector.shape_cast %141 : vector<1x1x16x16xf32> to vector<1x16x16xf32>
    %143 = vector.extract_strided_slice %142 {offsets = [0, 0, 1], sizes = [1, 16, 15], strides = [1, 1, 1]} : vector<1x16x16xf32> to vector<1x16x15xf32>
    %cst_21 = arith.constant 0.000000e+00 : f32
    %144 = vector.broadcast %cst_21 : f32 to vector<1x16x1xf32>
    %145 = tpu.concatenate %143, %144 in 2 : vector<1x16x15xf32>, vector<1x16x1xf32> -> vector<1x16x16xf32>
    %cst_22 = arith.constant 0.000000e+00 : f32
    %146 = vector.broadcast %cst_22 : f32 to vector<1x1x16xf32>
    %147 = vector.extract_strided_slice %138 {offsets = [0, 0, 0], sizes = [1, 15, 16], strides = [1, 1, 1]} : vector<1x16x16xf32> to vector<1x15x16xf32>
    %148 = tpu.concatenate %146, %147 in 1 : vector<1x1x16xf32>, vector<1x15x16xf32> -> vector<1x16x16xf32>
    %c18 = arith.constant 18 : index
    %149 = memref.load %arg1[%c18] : memref<36xf32, #tpu.memory_space<smem>>
    %150 = vector.broadcast %149 : f32 to vector<1x16x16xf32>
    %151 = arith.mulf %148, %150 : vector<1x16x16xf32>
    %152 = arith.addf %133, %151 : vector<1x16x16xf32>
    %cst_23 = arith.constant 0.000000e+00 : f32
    %153 = vector.broadcast %cst_23 : f32 to vector<1x1x16xf32>
    %154 = vector.extract_strided_slice %140 {offsets = [0, 0, 0], sizes = [1, 15, 16], strides = [1, 1, 1]} : vector<1x16x16xf32> to vector<1x15x16xf32>
    %155 = tpu.concatenate %153, %154 in 1 : vector<1x1x16xf32>, vector<1x15x16xf32> -> vector<1x16x16xf32>
    %c19 = arith.constant 19 : index
    %156 = memref.load %arg1[%c19] : memref<36xf32, #tpu.memory_space<smem>>
    %157 = vector.broadcast %156 : f32 to vector<1x16x16xf32>
    %158 = arith.mulf %155, %157 : vector<1x16x16xf32>
    %159 = arith.addf %152, %158 : vector<1x16x16xf32>
    %cst_24 = arith.constant 0.000000e+00 : f32
    %160 = vector.broadcast %cst_24 : f32 to vector<1x1x16xf32>
    %161 = vector.extract_strided_slice %145 {offsets = [0, 0, 0], sizes = [1, 15, 16], strides = [1, 1, 1]} : vector<1x16x16xf32> to vector<1x15x16xf32>
    %162 = tpu.concatenate %160, %161 in 1 : vector<1x1x16xf32>, vector<1x15x16xf32> -> vector<1x16x16xf32>
    %c20 = arith.constant 20 : index
    %163 = memref.load %arg1[%c20] : memref<36xf32, #tpu.memory_space<smem>>
    %164 = vector.broadcast %163 : f32 to vector<1x16x16xf32>
    %165 = arith.mulf %162, %164 : vector<1x16x16xf32>
    %166 = arith.addf %159, %165 : vector<1x16x16xf32>
    %c21 = arith.constant 21 : index
    %167 = memref.load %arg1[%c21] : memref<36xf32, #tpu.memory_space<smem>>
    %168 = vector.broadcast %167 : f32 to vector<1x16x16xf32>
    %169 = arith.mulf %138, %168 : vector<1x16x16xf32>
    %170 = arith.addf %166, %169 : vector<1x16x16xf32>
    %c22 = arith.constant 22 : index
    %171 = memref.load %arg1[%c22] : memref<36xf32, #tpu.memory_space<smem>>
    %172 = vector.broadcast %171 : f32 to vector<1x16x16xf32>
    %173 = arith.mulf %140, %172 : vector<1x16x16xf32>
    %174 = arith.addf %170, %173 : vector<1x16x16xf32>
    %c23 = arith.constant 23 : index
    %175 = memref.load %arg1[%c23] : memref<36xf32, #tpu.memory_space<smem>>
    %176 = vector.broadcast %175 : f32 to vector<1x16x16xf32>
    %177 = arith.mulf %145, %176 : vector<1x16x16xf32>
    %178 = arith.addf %174, %177 : vector<1x16x16xf32>
    %179 = vector.extract_strided_slice %138 {offsets = [0, 1, 0], sizes = [1, 15, 16], strides = [1, 1, 1]} : vector<1x16x16xf32> to vector<1x15x16xf32>
    %cst_25 = arith.constant 0.000000e+00 : f32
    %180 = vector.broadcast %cst_25 : f32 to vector<1x1x16xf32>
    %181 = tpu.concatenate %179, %180 in 1 : vector<1x15x16xf32>, vector<1x1x16xf32> -> vector<1x16x16xf32>
    %c24 = arith.constant 24 : index
    %182 = memref.load %arg1[%c24] : memref<36xf32, #tpu.memory_space<smem>>
    %183 = vector.broadcast %182 : f32 to vector<1x16x16xf32>
    %184 = arith.mulf %181, %183 : vector<1x16x16xf32>
    %185 = arith.addf %178, %184 : vector<1x16x16xf32>
    %186 = vector.extract_strided_slice %140 {offsets = [0, 1, 0], sizes = [1, 15, 16], strides = [1, 1, 1]} : vector<1x16x16xf32> to vector<1x15x16xf32>
    %cst_26 = arith.constant 0.000000e+00 : f32
    %187 = vector.broadcast %cst_26 : f32 to vector<1x1x16xf32>
    %188 = tpu.concatenate %186, %187 in 1 : vector<1x15x16xf32>, vector<1x1x16xf32> -> vector<1x16x16xf32>
    %c25 = arith.constant 25 : index
    %189 = memref.load %arg1[%c25] : memref<36xf32, #tpu.memory_space<smem>>
    %190 = vector.broadcast %189 : f32 to vector<1x16x16xf32>
    %191 = arith.mulf %188, %190 : vector<1x16x16xf32>
    %192 = arith.addf %185, %191 : vector<1x16x16xf32>
    %193 = vector.extract_strided_slice %145 {offsets = [0, 1, 0], sizes = [1, 15, 16], strides = [1, 1, 1]} : vector<1x16x16xf32> to vector<1x15x16xf32>
    %cst_27 = arith.constant 0.000000e+00 : f32
    %194 = vector.broadcast %cst_27 : f32 to vector<1x1x16xf32>
    %195 = tpu.concatenate %193, %194 in 1 : vector<1x15x16xf32>, vector<1x1x16xf32> -> vector<1x16x16xf32>
    %c26 = arith.constant 26 : index
    %196 = memref.load %arg1[%c26] : memref<36xf32, #tpu.memory_space<smem>>
    %197 = vector.broadcast %196 : f32 to vector<1x16x16xf32>
    %198 = arith.mulf %195, %197 : vector<1x16x16xf32>
    %199 = arith.addf %192, %198 : vector<1x16x16xf32>
    %200 = vector.extract_strided_slice %0 {offsets = [0, 3, 0, 0], sizes = [1, 1, 16, 16], strides = [1, 1, 1, 1]} : vector<1x4x16x16xf32> to vector<1x1x16x16xf32>
    %201 = vector.shape_cast %200 : vector<1x1x16x16xf32> to vector<1x16x16xf32>
    %cst_28 = arith.constant 0.000000e+00 : f32
    %202 = vector.broadcast %cst_28 : f32 to vector<1x16x1xf32>
    %203 = vector.extract_strided_slice %201 {offsets = [0, 0, 0], sizes = [1, 16, 15], strides = [1, 1, 1]} : vector<1x16x16xf32> to vector<1x16x15xf32>
    %204 = tpu.concatenate %202, %203 in 2 : vector<1x16x1xf32>, vector<1x16x15xf32> -> vector<1x16x16xf32>
    %205 = vector.extract_strided_slice %0 {offsets = [0, 3, 0, 0], sizes = [1, 1, 16, 16], strides = [1, 1, 1, 1]} : vector<1x4x16x16xf32> to vector<1x1x16x16xf32>
    %206 = vector.shape_cast %205 : vector<1x1x16x16xf32> to vector<1x16x16xf32>
    %207 = vector.extract_strided_slice %0 {offsets = [0, 3, 0, 0], sizes = [1, 1, 16, 16], strides = [1, 1, 1, 1]} : vector<1x4x16x16xf32> to vector<1x1x16x16xf32>
    %208 = vector.shape_cast %207 : vector<1x1x16x16xf32> to vector<1x16x16xf32>
    %209 = vector.extract_strided_slice %208 {offsets = [0, 0, 1], sizes = [1, 16, 15], strides = [1, 1, 1]} : vector<1x16x16xf32> to vector<1x16x15xf32>
    %cst_29 = arith.constant 0.000000e+00 : f32
    %210 = vector.broadcast %cst_29 : f32 to vector<1x16x1xf32>
    %211 = tpu.concatenate %209, %210 in 2 : vector<1x16x15xf32>, vector<1x16x1xf32> -> vector<1x16x16xf32>
    %cst_30 = arith.constant 0.000000e+00 : f32
    %212 = vector.broadcast %cst_30 : f32 to vector<1x1x16xf32>
    %213 = vector.extract_strided_slice %204 {offsets = [0, 0, 0], sizes = [1, 15, 16], strides = [1, 1, 1]} : vector<1x16x16xf32> to vector<1x15x16xf32>
    %214 = tpu.concatenate %212, %213 in 1 : vector<1x1x16xf32>, vector<1x15x16xf32> -> vector<1x16x16xf32>
    %c27 = arith.constant 27 : index
    %215 = memref.load %arg1[%c27] : memref<36xf32, #tpu.memory_space<smem>>
    %216 = vector.broadcast %215 : f32 to vector<1x16x16xf32>
    %217 = arith.mulf %214, %216 : vector<1x16x16xf32>
    %218 = arith.addf %199, %217 : vector<1x16x16xf32>
    %cst_31 = arith.constant 0.000000e+00 : f32
    %219 = vector.broadcast %cst_31 : f32 to vector<1x1x16xf32>
    %220 = vector.extract_strided_slice %206 {offsets = [0, 0, 0], sizes = [1, 15, 16], strides = [1, 1, 1]} : vector<1x16x16xf32> to vector<1x15x16xf32>
    %221 = tpu.concatenate %219, %220 in 1 : vector<1x1x16xf32>, vector<1x15x16xf32> -> vector<1x16x16xf32>
    %c28 = arith.constant 28 : index
    %222 = memref.load %arg1[%c28] : memref<36xf32, #tpu.memory_space<smem>>
    %223 = vector.broadcast %222 : f32 to vector<1x16x16xf32>
    %224 = arith.mulf %221, %223 : vector<1x16x16xf32>
    %225 = arith.addf %218, %224 : vector<1x16x16xf32>
    %cst_32 = arith.constant 0.000000e+00 : f32
    %226 = vector.broadcast %cst_32 : f32 to vector<1x1x16xf32>
    %227 = vector.extract_strided_slice %211 {offsets = [0, 0, 0], sizes = [1, 15, 16], strides = [1, 1, 1]} : vector<1x16x16xf32> to vector<1x15x16xf32>
    %228 = tpu.concatenate %226, %227 in 1 : vector<1x1x16xf32>, vector<1x15x16xf32> -> vector<1x16x16xf32>
    %c29 = arith.constant 29 : index
    %229 = memref.load %arg1[%c29] : memref<36xf32, #tpu.memory_space<smem>>
    %230 = vector.broadcast %229 : f32 to vector<1x16x16xf32>
    %231 = arith.mulf %228, %230 : vector<1x16x16xf32>
    %232 = arith.addf %225, %231 : vector<1x16x16xf32>
    %c30 = arith.constant 30 : index
    %233 = memref.load %arg1[%c30] : memref<36xf32, #tpu.memory_space<smem>>
    %234 = vector.broadcast %233 : f32 to vector<1x16x16xf32>
    %235 = arith.mulf %204, %234 : vector<1x16x16xf32>
    %236 = arith.addf %232, %235 : vector<1x16x16xf32>
    %c31 = arith.constant 31 : index
    %237 = memref.load %arg1[%c31] : memref<36xf32, #tpu.memory_space<smem>>
    %238 = vector.broadcast %237 : f32 to vector<1x16x16xf32>
    %239 = arith.mulf %206, %238 : vector<1x16x16xf32>
    %240 = arith.addf %236, %239 : vector<1x16x16xf32>
    %c32 = arith.constant 32 : index
    %241 = memref.load %arg1[%c32] : memref<36xf32, #tpu.memory_space<smem>>
    %242 = vector.broadcast %241 : f32 to vector<1x16x16xf32>
    %243 = arith.mulf %211, %242 : vector<1x16x16xf32>
    %244 = arith.addf %240, %243 : vector<1x16x16xf32>
    %245 = vector.extract_strided_slice %204 {offsets = [0, 1, 0], sizes = [1, 15, 16], strides = [1, 1, 1]} : vector<1x16x16xf32> to vector<1x15x16xf32>
    %cst_33 = arith.constant 0.000000e+00 : f32
    %246 = vector.broadcast %cst_33 : f32 to vector<1x1x16xf32>
    %247 = tpu.concatenate %245, %246 in 1 : vector<1x15x16xf32>, vector<1x1x16xf32> -> vector<1x16x16xf32>
    %c33 = arith.constant 33 : index
    %248 = memref.load %arg1[%c33] : memref<36xf32, #tpu.memory_space<smem>>
    %249 = vector.broadcast %248 : f32 to vector<1x16x16xf32>
    %250 = arith.mulf %247, %249 : vector<1x16x16xf32>
    %251 = arith.addf %244, %250 : vector<1x16x16xf32>
    %252 = vector.extract_strided_slice %206 {offsets = [0, 1, 0], sizes = [1, 15, 16], strides = [1, 1, 1]} : vector<1x16x16xf32> to vector<1x15x16xf32>
    %cst_34 = arith.constant 0.000000e+00 : f32
    %253 = vector.broadcast %cst_34 : f32 to vector<1x1x16xf32>
    %254 = tpu.concatenate %252, %253 in 1 : vector<1x15x16xf32>, vector<1x1x16xf32> -> vector<1x16x16xf32>
    %c34 = arith.constant 34 : index
    %255 = memref.load %arg1[%c34] : memref<36xf32, #tpu.memory_space<smem>>
    %256 = vector.broadcast %255 : f32 to vector<1x16x16xf32>
    %257 = arith.mulf %254, %256 : vector<1x16x16xf32>
    %258 = arith.addf %251, %257 : vector<1x16x16xf32>
    %259 = vector.extract_strided_slice %211 {offsets = [0, 1, 0], sizes = [1, 15, 16], strides = [1, 1, 1]} : vector<1x16x16xf32> to vector<1x15x16xf32>
    %cst_35 = arith.constant 0.000000e+00 : f32
    %260 = vector.broadcast %cst_35 : f32 to vector<1x1x16xf32>
    %261 = tpu.concatenate %259, %260 in 1 : vector<1x15x16xf32>, vector<1x1x16xf32> -> vector<1x16x16xf32>
    %c35 = arith.constant 35 : index
    %262 = memref.load %arg1[%c35] : memref<36xf32, #tpu.memory_space<smem>>
    %263 = vector.broadcast %262 : f32 to vector<1x16x16xf32>
    %264 = arith.mulf %261, %263 : vector<1x16x16xf32>
    %265 = arith.addf %258, %264 : vector<1x16x16xf32>
    %c0_36 = arith.constant 0 : index
    %266 = memref.load %arg2[%c0_36] : memref<1xf32, #tpu.memory_space<smem>>
    %267 = vector.broadcast %266 : f32 to vector<1x16x16xf32>
    %268 = arith.addf %265, %267 : vector<1x16x16xf32>
    %cst_37 = arith.constant 0.000000e+00 : f32
    %269 = vector.broadcast %cst_37 : f32 to vector<1x16x16xf32>
    %270 = arith.maximumf %268, %269 : vector<1x16x16xf32>
    %271 = tpu.iota {dimensions = array<i32: 0>} : vector<16x16xi32>
    %c2_i32 = arith.constant 2 : i32
    %c0_i32 = arith.constant 0 : i32
    %272 = arith.cmpi eq, %c2_i32, %c0_i32 : i32
    %c1_i32 = arith.constant 1 : i32
    %273 = arith.select %272, %c1_i32, %c2_i32 : i32
    %274 = vector.broadcast %273 : i32 to vector<16x16xi32>
    %275 = arith.remsi %271, %274 : vector<16x16xi32>
    %c0_i32_38 = arith.constant 0 : i32
    %276 = vector.broadcast %c0_i32_38 : i32 to vector<16x16xi32>
    %277 = arith.cmpi ne, %275, %276 : vector<16x16xi32>
    %c0_i32_39 = arith.constant 0 : i32
    %278 = vector.broadcast %c0_i32_39 : i32 to vector<16x16xi32>
    %279 = arith.cmpi slt, %275, %278 : vector<16x16xi32>
    %c0_i32_40 = arith.constant 0 : i32
    %280 = arith.cmpi slt, %273, %c0_i32_40 : i32
    %281 = vector.broadcast %280 : i1 to vector<16x16xi1>
    %282 = vector.broadcast %281 : vector<16x16xi1> to vector<16x16xi1>
    %283 = arith.xori %279, %282 : vector<16x16xi1>
    %284 = arith.andi %283, %277 : vector<16x16xi1>
    %285 = vector.broadcast %273 : i32 to vector<16x16xi32>
    %286 = arith.addi %275, %285 : vector<16x16xi32>
    %287 = arith.select %284, %286, %275 : vector<16x16xi1>, vector<16x16xi32>
    %c0_i32_41 = arith.constant 0 : i32
    %288 = vector.broadcast %c0_i32_41 : i32 to vector<16x16xi32>
    %289 = arith.cmpi eq, %287, %288 : vector<16x16xi32>
    %290 = tpu.iota {dimensions = array<i32: 1>} : vector<16x16xi32>
    %c2_i32_42 = arith.constant 2 : i32
    %c0_i32_43 = arith.constant 0 : i32
    %291 = arith.cmpi eq, %c2_i32_42, %c0_i32_43 : i32
    %c1_i32_44 = arith.constant 1 : i32
    %292 = arith.select %291, %c1_i32_44, %c2_i32_42 : i32
    %293 = vector.broadcast %292 : i32 to vector<16x16xi32>
    %294 = arith.remsi %290, %293 : vector<16x16xi32>
    %c0_i32_45 = arith.constant 0 : i32
    %295 = vector.broadcast %c0_i32_45 : i32 to vector<16x16xi32>
    %296 = arith.cmpi ne, %294, %295 : vector<16x16xi32>
    %c0_i32_46 = arith.constant 0 : i32
    %297 = vector.broadcast %c0_i32_46 : i32 to vector<16x16xi32>
    %298 = arith.cmpi slt, %294, %297 : vector<16x16xi32>
    %c0_i32_47 = arith.constant 0 : i32
    %299 = arith.cmpi slt, %292, %c0_i32_47 : i32
    %300 = vector.broadcast %299 : i1 to vector<16x16xi1>
    %301 = vector.broadcast %300 : vector<16x16xi1> to vector<16x16xi1>
    %302 = arith.xori %298, %301 : vector<16x16xi1>
    %303 = arith.andi %302, %296 : vector<16x16xi1>
    %304 = vector.broadcast %292 : i32 to vector<16x16xi32>
    %305 = arith.addi %294, %304 : vector<16x16xi32>
    %306 = arith.select %303, %305, %294 : vector<16x16xi1>, vector<16x16xi32>
    %c0_i32_48 = arith.constant 0 : i32
    %307 = vector.broadcast %c0_i32_48 : i32 to vector<16x16xi32>
    %308 = arith.cmpi eq, %306, %307 : vector<16x16xi32>
    %309 = vector.extract_strided_slice %270 {offsets = [0, 1, 0], sizes = [1, 15, 16], strides = [1, 1, 1]} : vector<1x16x16xf32> to vector<1x15x16xf32>
    %cst_49 = arith.constant 0.000000e+00 : f32
    %310 = vector.broadcast %cst_49 : f32 to vector<1x1x16xf32>
    %311 = tpu.concatenate %309, %310 in 1 : vector<1x15x16xf32>, vector<1x1x16xf32> -> vector<1x16x16xf32>
    %cst_50 = arith.constant 0.000000e+00 : f32
    %312 = vector.broadcast %cst_50 : f32 to vector<1x1x16xf32>
    %313 = vector.extract_strided_slice %270 {offsets = [0, 0, 0], sizes = [1, 15, 16], strides = [1, 1, 1]} : vector<1x16x16xf32> to vector<1x15x16xf32>
    %314 = tpu.concatenate %312, %313 in 1 : vector<1x1x16xf32>, vector<1x15x16xf32> -> vector<1x16x16xf32>
    %315 = vector.shape_cast %289 : vector<16x16xi1> to vector<1x16x16xi1>
    %316 = arith.select %315, %311, %314 : vector<1x16x16xi1>, vector<1x16x16xf32>
    %317 = arith.addf %270, %316 : vector<1x16x16xf32>
    %318 = vector.extract_strided_slice %317 {offsets = [0, 0, 1], sizes = [1, 16, 15], strides = [1, 1, 1]} : vector<1x16x16xf32> to vector<1x16x15xf32>
    %cst_51 = arith.constant 0.000000e+00 : f32
    %319 = vector.broadcast %cst_51 : f32 to vector<1x16x1xf32>
    %320 = tpu.concatenate %318, %319 in 2 : vector<1x16x15xf32>, vector<1x16x1xf32> -> vector<1x16x16xf32>
    %cst_52 = arith.constant 0.000000e+00 : f32
    %321 = vector.broadcast %cst_52 : f32 to vector<1x16x1xf32>
    %322 = vector.extract_strided_slice %317 {offsets = [0, 0, 0], sizes = [1, 16, 15], strides = [1, 1, 1]} : vector<1x16x16xf32> to vector<1x16x15xf32>
    %323 = tpu.concatenate %321, %322 in 2 : vector<1x16x1xf32>, vector<1x16x15xf32> -> vector<1x16x16xf32>
    %324 = vector.shape_cast %308 : vector<16x16xi1> to vector<1x16x16xi1>
    %325 = arith.select %324, %320, %323 : vector<1x16x16xi1>, vector<1x16x16xf32>
    %326 = arith.addf %317, %325 : vector<1x16x16xf32>
    %cst_53 = arith.constant 9.99999974E-6 : f32
    %327 = vector.broadcast %cst_53 : f32 to vector<1x16x16xf32>
    %328 = arith.addf %326, %327 : vector<1x16x16xf32>
    %329 = arith.divf %270, %328 : vector<1x16x16xf32>
    %c0_54 = arith.constant 0 : index
    %c0_55 = arith.constant 0 : index
    %c0_56 = arith.constant 0 : index
    %c0_57 = arith.constant 0 : index
    %330 = vector.load %arg4[%c0_54, %c0_55, %c0_56, %c0_57] : memref<1x1x8x8xf32, #tpu.memory_space<vmem>>, vector<1x1x8x8xf32>
    %331 = vector.shape_cast %330 : vector<1x1x8x8xf32> to vector<1x8x8xf32>
    %332 = vector.extract_strided_slice %331 {offsets = [0, 0, 0], sizes = [1, 1, 8], strides = [1, 1, 1]} : vector<1x8x8xf32> to vector<1x1x8xf32>
    %333 = vector.extract_strided_slice %331 {offsets = [0, 0, 0], sizes = [1, 1, 8], strides = [1, 1, 1]} : vector<1x8x8xf32> to vector<1x1x8xf32>
    %334 = vector.extract_strided_slice %331 {offsets = [0, 1, 0], sizes = [1, 1, 8], strides = [1, 1, 1]} : vector<1x8x8xf32> to vector<1x1x8xf32>
    %335 = vector.extract_strided_slice %331 {offsets = [0, 1, 0], sizes = [1, 1, 8], strides = [1, 1, 1]} : vector<1x8x8xf32> to vector<1x1x8xf32>
    %336 = vector.extract_strided_slice %331 {offsets = [0, 2, 0], sizes = [1, 1, 8], strides = [1, 1, 1]} : vector<1x8x8xf32> to vector<1x1x8xf32>
    %337 = vector.extract_strided_slice %331 {offsets = [0, 2, 0], sizes = [1, 1, 8], strides = [1, 1, 1]} : vector<1x8x8xf32> to vector<1x1x8xf32>
    %338 = vector.extract_strided_slice %331 {offsets = [0, 3, 0], sizes = [1, 1, 8], strides = [1, 1, 1]} : vector<1x8x8xf32> to vector<1x1x8xf32>
    %339 = vector.extract_strided_slice %331 {offsets = [0, 3, 0], sizes = [1, 1, 8], strides = [1, 1, 1]} : vector<1x8x8xf32> to vector<1x1x8xf32>
    %340 = vector.extract_strided_slice %331 {offsets = [0, 4, 0], sizes = [1, 1, 8], strides = [1, 1, 1]} : vector<1x8x8xf32> to vector<1x1x8xf32>
    %341 = vector.extract_strided_slice %331 {offsets = [0, 4, 0], sizes = [1, 1, 8], strides = [1, 1, 1]} : vector<1x8x8xf32> to vector<1x1x8xf32>
    %342 = vector.extract_strided_slice %331 {offsets = [0, 5, 0], sizes = [1, 1, 8], strides = [1, 1, 1]} : vector<1x8x8xf32> to vector<1x1x8xf32>
    %343 = vector.extract_strided_slice %331 {offsets = [0, 5, 0], sizes = [1, 1, 8], strides = [1, 1, 1]} : vector<1x8x8xf32> to vector<1x1x8xf32>
    %344 = vector.extract_strided_slice %331 {offsets = [0, 6, 0], sizes = [1, 1, 8], strides = [1, 1, 1]} : vector<1x8x8xf32> to vector<1x1x8xf32>
    %345 = vector.extract_strided_slice %331 {offsets = [0, 6, 0], sizes = [1, 1, 8], strides = [1, 1, 1]} : vector<1x8x8xf32> to vector<1x1x8xf32>
    %346 = vector.extract_strided_slice %331 {offsets = [0, 7, 0], sizes = [1, 1, 8], strides = [1, 1, 1]} : vector<1x8x8xf32> to vector<1x1x8xf32>
    %347 = vector.extract_strided_slice %331 {offsets = [0, 7, 0], sizes = [1, 1, 8], strides = [1, 1, 1]} : vector<1x8x8xf32> to vector<1x1x8xf32>
    %348 = tpu.concatenate %332, %333, %334, %335, %336, %337, %338, %339, %340, %341, %342, %343, %344, %345, %346, %347 in 1 : vector<1x1x8xf32>, vector<1x1x8xf32>, vector<1x1x8xf32>, vector<1x1x8xf32>, vector<1x1x8xf32>, vector<1x1x8xf32>, vector<1x1x8xf32>, vector<1x1x8xf32>, vector<1x1x8xf32>, vector<1x1x8xf32>, vector<1x1x8xf32>, vector<1x1x8xf32>, vector<1x1x8xf32>, vector<1x1x8xf32>, vector<1x1x8xf32>, vector<1x1x8xf32> -> vector<1x16x8xf32>
    %349 = vector.extract_strided_slice %348 {offsets = [0, 0, 0], sizes = [1, 16, 1], strides = [1, 1, 1]} : vector<1x16x8xf32> to vector<1x16x1xf32>
    %350 = vector.extract_strided_slice %348 {offsets = [0, 0, 0], sizes = [1, 16, 1], strides = [1, 1, 1]} : vector<1x16x8xf32> to vector<1x16x1xf32>
    %351 = vector.extract_strided_slice %348 {offsets = [0, 0, 1], sizes = [1, 16, 1], strides = [1, 1, 1]} : vector<1x16x8xf32> to vector<1x16x1xf32>
    %352 = vector.extract_strided_slice %348 {offsets = [0, 0, 1], sizes = [1, 16, 1], strides = [1, 1, 1]} : vector<1x16x8xf32> to vector<1x16x1xf32>
    %353 = vector.extract_strided_slice %348 {offsets = [0, 0, 2], sizes = [1, 16, 1], strides = [1, 1, 1]} : vector<1x16x8xf32> to vector<1x16x1xf32>
    %354 = vector.extract_strided_slice %348 {offsets = [0, 0, 2], sizes = [1, 16, 1], strides = [1, 1, 1]} : vector<1x16x8xf32> to vector<1x16x1xf32>
    %355 = vector.extract_strided_slice %348 {offsets = [0, 0, 3], sizes = [1, 16, 1], strides = [1, 1, 1]} : vector<1x16x8xf32> to vector<1x16x1xf32>
    %356 = vector.extract_strided_slice %348 {offsets = [0, 0, 3], sizes = [1, 16, 1], strides = [1, 1, 1]} : vector<1x16x8xf32> to vector<1x16x1xf32>
    %357 = vector.extract_strided_slice %348 {offsets = [0, 0, 4], sizes = [1, 16, 1], strides = [1, 1, 1]} : vector<1x16x8xf32> to vector<1x16x1xf32>
    %358 = vector.extract_strided_slice %348 {offsets = [0, 0, 4], sizes = [1, 16, 1], strides = [1, 1, 1]} : vector<1x16x8xf32> to vector<1x16x1xf32>
    %359 = vector.extract_strided_slice %348 {offsets = [0, 0, 5], sizes = [1, 16, 1], strides = [1, 1, 1]} : vector<1x16x8xf32> to vector<1x16x1xf32>
    %360 = vector.extract_strided_slice %348 {offsets = [0, 0, 5], sizes = [1, 16, 1], strides = [1, 1, 1]} : vector<1x16x8xf32> to vector<1x16x1xf32>
    %361 = vector.extract_strided_slice %348 {offsets = [0, 0, 6], sizes = [1, 16, 1], strides = [1, 1, 1]} : vector<1x16x8xf32> to vector<1x16x1xf32>
    %362 = vector.extract_strided_slice %348 {offsets = [0, 0, 6], sizes = [1, 16, 1], strides = [1, 1, 1]} : vector<1x16x8xf32> to vector<1x16x1xf32>
    %363 = vector.extract_strided_slice %348 {offsets = [0, 0, 7], sizes = [1, 16, 1], strides = [1, 1, 1]} : vector<1x16x8xf32> to vector<1x16x1xf32>
    %364 = vector.extract_strided_slice %348 {offsets = [0, 0, 7], sizes = [1, 16, 1], strides = [1, 1, 1]} : vector<1x16x8xf32> to vector<1x16x1xf32>
    %365 = tpu.concatenate %349, %350, %351, %352, %353, %354, %355, %356, %357, %358, %359, %360, %361, %362, %363, %364 in 2 : vector<1x16x1xf32>, vector<1x16x1xf32>, vector<1x16x1xf32>, vector<1x16x1xf32>, vector<1x16x1xf32>, vector<1x16x1xf32>, vector<1x16x1xf32>, vector<1x16x1xf32>, vector<1x16x1xf32>, vector<1x16x1xf32>, vector<1x16x1xf32>, vector<1x16x1xf32>, vector<1x16x1xf32>, vector<1x16x1xf32>, vector<1x16x1xf32>, vector<1x16x1xf32> -> vector<1x16x16xf32>
    %366 = arith.mulf %329, %365 : vector<1x16x16xf32>
    %c0_58 = arith.constant 0 : index
    %c0_59 = arith.constant 0 : index
    %c0_60 = arith.constant 0 : index
    %c0_61 = arith.constant 0 : index
    %367 = vector.load %arg5[%c0_58, %c0_59, %c0_60, %c0_61] : memref<1x1x16x16xf32, #tpu.memory_space<vmem>>, vector<1x1x16x16xf32>
    %368 = vector.shape_cast %367 : vector<1x1x16x16xf32> to vector<1x16x16xf32>
    %369 = vector.shape_cast %366 : vector<1x16x16xf32> to vector<1x1x16x16xf32>
    tpu.vector_store %arg5[%c0_58, %c0_59, %c0_60, %c0_61], %369 {strides = array<i32>} : memref<1x1x16x16xf32, #tpu.memory_space<vmem>>, vector<1x1x16x16xf32>,
    return
  }
  func.func @transform_0(%arg0: i32) -> i32 {
    %c0_i32 = arith.constant 0 : i32
    %c0_i32_0 = arith.constant 0 : i32
    return %c0_i32 : i32
  }
  func.func @transform_1(%arg0: i32) -> i32 {
    %c0_i32 = arith.constant 0 : i32
    %c0_i32_0 = arith.constant 0 : i32
    return %c0_i32 : i32
  }
  func.func @transform_2(%arg0: i32) -> (i32, i32, i32, i32) {
    %c0_i32 = arith.constant 0 : i32
    %c0_i32_0 = arith.constant 0 : i32
    %c0_i32_1 = arith.constant 0 : i32
    %c0_i32_2 = arith.constant 0 : i32
    return %arg0, %c0_i32, %c0_i32_0, %c0_i32_1 : i32, i32, i32, i32
  }
  func.func @transform_3(%arg0: i32) -> (i32, i32, i32, i32) {
    %c0_i32 = arith.constant 0 : i32
    %c0_i32_0 = arith.constant 0 : i32
    %c0_i32_1 = arith.constant 0 : i32
    %c0_i32_2 = arith.constant 0 : i32
    return %arg0, %c0_i32, %c0_i32_0, %c0_i32_1 : i32, i32, i32, i32
  }
  func.func @transform_4(%arg0: i32) -> (i32, i32, i32, i32) {
    %c0_i32 = arith.constant 0 : i32
    %c0_i32_0 = arith.constant 0 : i32
    %c0_i32_1 = arith.constant 0 : i32
    %c0_i32_2 = arith.constant 0 : i32
    return %arg0, %c0_i32, %c0_i32_0, %c0_i32_1 : i32, i32, i32, i32
  }
}

</mosaic_0001>

<bundles_post_ra>
// kernel: tpu_custom_call.1
= control target key start
LH: loop header
LB: loop body
LE: loop exit
PB: predicated region body
PF: predicated region fallthrough
CT: control target
= control target key end

     0   :  { %s2085_s0 = inlined_call_operand.vmem [shape: f32[36], index: 0, kind: input, shape index: {}]   ;;  %s2086_s1 = inlined_call_operand.<no memory space> [shape: f32[1], index: 1, kind: input, shape index: {}]   ;;  %s2087_s2 = inlined_call_operand.hbm [shape: f32[2,4,16,16], index: 2, kind: input, shape index: {}]   ;;  %s2088_s3 = inlined_call_operand.hbm [shape: f32[2,1,8,8], index: 3, kind: input, shape index: {}]   ;;  %s2089_s4 = inlined_call_operand.hbm [shape: f32[2,1,16,16], index: 4, kind: output, shape index: {}]  }
   0x1   :  { %9 = sst [smem:[#allocation2]] %s2086_s1 }
   0x2   :  { %10 = vsyncpa [#allocation6], 0 }
   0x3   :  { %11 = vsyncpa [#allocation4], 0 }
   0x4   :  { %13 = vsyncpa [#allocation4 + $0x1], 0 }
   0x5   :  { %14 = vsyncpa [#allocation9], 0 }
   0x6   :  { %16 = vsyncpa [#allocation9 + $0x1], 0 }
   0x7   :  { %17 = vsyncpa [#allocation5], 0 }
   0x8   :  { %19 = vsyncpa [#allocation5 + $0x1], 0  ;;  %s1408_s17 = smov 0   ;;  %s1410_s18 = smov 0  }
   0x9   :  { %s1412_s19 = smov 0   ;;  %s1414_s20 = smov 0  }
   0xa LB: > { %s1429_s1 = sadd.s32 4294967295, %s1362_s20   ;;  %s1079_s21 = sadd.s32 4294967294, %s1362_s20   ;;  %s1362_s20 = sphi %s1414_s20, %s2111_s20   ;;  %s1358_s19 = sphi %s1412_s19, %s2110_s19   ;;  %s1354_s18 = sphi %s1410_s18, %s2109_s18   ;;  %s1350_s17 = sphi %s1408_s17, %s2108_s17  }
   0xb   : > { %s1433_s22 = sadd.s32 1, %s1362_s20   ;;  %s74_s23 = sadd.s32 1, %s1358_s19 }
   0xc   : > { %s71_s24 = ssub.s32 %s1362_s20, %s1433_s22  ;;  %p81_p0 = scmp.ne.s32.totalorder %s1358_s19, %s1354_s18 }
   0xd   : > { %p72_p1 = scmp.eq.s32.totalorder %s71_s24, 0  ;;  %p82_p2 = scmp.eq.s32.totalorder %s1362_s20, 0 }
   0xe   : > { %p87_p3 = scmp.ne.s32.totalorder %s1354_s18, %s1350_s17  ;;  %p2090_p4 = scmp.eq.s32.totalorder %s1429_s1, 0 }
   0xf   : > { %s1445_s25 = scalar_select %p72_p1, %s1358_s19, %s74_s23  }
  0x10   : > { %p1447_p5 = por %p82_p2, %p81_p0  ;;  %p1453_p6 = por %p2090_p4, %p87_p3 }
  0x11   : > { %p137_p7 = scmp.eq.s32.totalorder %s1429_s1, 1  ;;  %p143_p8 = scmp.eq.s32.totalorder %s1079_s21, 1 }
  0x12   : > { %s2095_s27 = scalar_select %p1453_p6, 1, 0 }
  0x13   : > { %p1080_p9 = scmp.ge.s32.totalorder %s1362_s20, 1  ;;  %p150_p10 = scmp.lt.s32.totalorder %s1362_s20, 3 }
  0x14   : > { %p1460_p11 = por %p137_p7, %p81_p0  ;;  %p1464_p12 = por %p143_p8, %p87_p3 }
  0x15   : > { %p1468_p13 = pnand %p1080_p9, %p150_p10  ;;  %s163_s7 = sshll.u32 %s2085_s0, 4  ;;  %s164_s7 = int_to_ptr.vmem [resolvable:$true] %s163_s7 }
  0x16   : > { %s2096_s28 = scalar_select %p1460_p11, 1, 0 }
  0x17   : > { %s2097_s29 = scalar_select %p1464_p12, 1, 0 }
  0x18   : > { %s2098_s30 = scalar_select %p1468_p13, 1, 0 }
  0x19   : > { %p1145_p1 = pneg %p1468_p13  ;;  %p1161_p2 = scmp.lt.s32.totalorder %s1362_s20, 2 }
  0x1a   : > { %s1486_s9 = sand.u32 1, %s1358_s19   ;;  %s1213_s12 = scalar_lea.vmem %s164_s7, 16 }
  0x1b   : > { %p1481_p7 = pnand %p1145_p1, %p2090_p4  ;;  %p1490_p3 = pnand %p1161_p2, %p1447_p5 }
  0x1c   : > { %s1083_s11 = sshll.u32 %s1486_s9, 6  ;;  %p1214_p8 = scmp.ne.s32.totalorder %s164_s7, %s1213_s12 }
  0x1d   : > { %p1215_p9 = pneg %p1481_p7  ;;  %p1221_p1 = scmp.lt.s32.totalorder %s164_s7, %s164_s7 }
  0x1e   : > { %p1222_p4 = scmp.lt.s32.totalorder %s1213_s12, %s1213_s12 }
  0x1f   : > { %p1216_p10 = pnand %p1215_p9, %p1214_p8 }
  0x20   : > { %p1223_p12 = por %p1222_p4, %p1221_p1 }
  0x21   : > { %p1217_p0 = pneg %p1216_p10 }
  0x23   : > { %p1224_p11 = pnand %p1223_p12, %p1217_p0 }
  0x25   : > { %1227 = shalt.err (!%p1224_p11)
}
  0x26   : > { %s1364_s13 = smov [#allocation3]   ;;  %s1133_s14 = sshll.u32 %s1362_s20, 10 }
  0x27   : > { %1148 = dma.vmem_to_smem (!%p1481_p7), %s164_s7, 16, %s1364_s13, [#allocation6]  }
  0x28   : > { %s181_s15 = scalar_lea.vmem [#allocation7], %s1083_s11  ;;  %s1503_s24 = scalar_lea.hbm %s2087_s2, %s1133_s14 }
  0x29   : > { %s188_s16 = sshll.u32 %s181_s15, 4  ;;  %s178_s26 = scalar_lea.sflag [#allocation4], %s1486_s9  ;;  %s1505_s16 = int_to_ptr.vmem [resolvable:$true] %s188_s16 }
  0x2a   : > { %s1228_s5 = scalar_lea.hbm %s1503_s24, 1024  ;;  %p1230_p5 = pneg %p1490_p3 }
  0x2b   : > { %p1229_p4 = scmp.ne.s32.totalorder %s1503_s24, %s1228_s5  ;;  %s1233_s8 = scalar_lea.hbm %s2087_s2, 2048 }
  0x2c   : > { %p1234_p0 = scmp.lt.u32.totalorder %s1503_s24, %s2087_s2  ;;  %p1235_p2 = scmp.lt.u32.totalorder %s1233_s8, %s1228_s5 }
  0x2d   : > { %p1231_p11 = pnand %p1230_p5, %p1229_p4  ;;  %p1237_p8 = scmp.lt.u32.totalorder %s1228_s5, %s1503_s24 }
  0x2e   : > { %p1236_p7 = por %p1235_p2, %p1234_p0 }
  0x2f   : > { %p1232_p12 = pneg %p1231_p11 }
  0x30   : > { %p1238_p9 = por %p1237_p8, %p1236_p7 }
  0x32   : > { %p1239_p10 = pnand %p1238_p9, %p1232_p12 }
  0x34   : > { %1242 = shalt.err (!%p1239_p10)
}
  0x35   : > { %s1243_s13 = scalar_lea.vmem %s1505_s16, 1024  ;;  %s1365_s14 = smov [#allocation7]  }
  0x36   : > { %p1244_p1 = scmp.ne.s32.totalorder %s1505_s16, %s1243_s13  ;;  %s1248_s15 = sshll.u32 %s1365_s14, 4  ;;  %s1249_s15 = int_to_ptr.vmem [resolvable:$false] %s1248_s15 }
  0x37   : > { %s1250_s21 = scalar_lea.vmem %s1249_s15, 2048  ;;  %p1251_p6 = scmp.lt.s32.totalorder %s1505_s16, %s1249_s15 }
  0x38   : > { %p1246_p4 = pnand %p1244_p1, %p1230_p5  ;;  %p1252_p0 = scmp.lt.s32.totalorder %s1250_s21, %s1243_s13 }
  0x3a   : > { %p1247_p11 = pneg %p1246_p4  ;;  %p1253_p2 = por %p1252_p0, %p1251_p6 }
  0x3c   : > { %p1254_p7 = pnand %p1253_p2, %p1247_p11 }
  0x3e   : > { %1257 = shalt.err (!%p1254_p7)
}
  0x3f   : > { %s1366_s23 = smov 128   ;;  %s1367_s5 = smov 8  }
  0x40   : > { %1152 = dma.hbm_to_vmem [thread:$0]  (!%p1490_p3), %s1503_s24, 1024, %s1505_s16, %s178_s26, %s1366_s23, %s1366_s23, %s1367_s5  }
  0x41   : > { %s1086_s6 = sshll.u32 %s1486_s9, 3  ;;  %s1087_s7 = sshll.u32 %s1362_s20, 7 }
  0x42   : > { %s1540_s12 = scalar_lea.hbm %s2088_s3, %s1087_s7  ;;  %s202_s13 = scalar_lea.vmem [#allocation8], %s1086_s6 }
  0x43   : > { %s209_s14 = sshll.u32 %s202_s13, 4  ;;  %s199_s15 = scalar_lea.sflag [#allocation9], %s1486_s9  ;;  %s210_s14 = int_to_ptr.vmem [resolvable:$true] %s209_s14 }
  0x44   : > { %s1258_s21 = scalar_lea.hbm %s1540_s12, 128  ;;  %s1263_s26 = scalar_lea.hbm %s2088_s3, 256 }
  0x45   : > { %p1259_p6 = scmp.ne.s32.totalorder %s1540_s12, %s1258_s21  ;;  %p1264_p9 = scmp.lt.u32.totalorder %s1540_s12, %s2088_s3 }
  0x46   : > { %p1265_p10 = scmp.lt.u32.totalorder %s1263_s26, %s1258_s21  ;;  %p1267_p4 = scmp.lt.u32.totalorder %s1258_s21, %s1540_s12 }
  0x47   : > { %p1261_p12 = pnand %p1259_p6, %p1230_p5 }
  0x48   : > { %p1266_p1 = por %p1265_p10, %p1264_p9 }
  0x49   : > { %p1262_p8 = pneg %p1261_p12 }
  0x4a   : > { %p1268_p11 = por %p1267_p4, %p1266_p1 }
  0x4c   : > { %p1269_p0 = pnand %p1268_p11, %p1262_p8 }
  0x4e   : > { %1272 = shalt.err (!%p1269_p0)
}
  0x4f   : > { %s1273_s9 = scalar_lea.vmem %s210_s14, 128  ;;  %s1368_s6 = smov [#allocation8]  }
  0x50   : > { %p1274_p2 = scmp.ne.s32.totalorder %s210_s14, %s1273_s9  ;;  %s1278_s7 = sshll.u32 %s1368_s6, 4  ;;  %s1279_s7 = int_to_ptr.vmem [resolvable:$false] %s1278_s7 }
  0x51   : > { %s1280_s8 = scalar_lea.vmem %s1279_s7, 256  ;;  %p1281_p12 = scmp.lt.s32.totalorder %s210_s14, %s1279_s7 }
  0x52   : > { %p1276_p7 = pnand %p1274_p2, %p1230_p5  ;;  %p1282_p13 = scmp.lt.s32.totalorder %s1280_s8, %s1273_s9 }
  0x54   : > { %p1277_p6 = pneg %p1276_p7  ;;  %p1283_p9 = por %p1282_p13, %p1281_p12 }
  0x56   : > { %p1284_p10 = pnand %p1283_p9, %p1277_p6 }
  0x58   : > { %1287 = shalt.err (!%p1284_p10)
}
  0x59   : > { %1155 = dma.hbm_to_vmem [thread:$0]  (!%p1490_p3), %s1540_s12, 128, %s210_s14, %s199_s15  }
  0x5a   : > { %p2101_p8 = scmp.ne.s32.totalorder %s2098_s30, 0 }
  0x5b   : > { %p2102_p1 = scmp.eq.s32.totalorder (!%p2101_p8), %s1429_s1, 0 }
  0x5c   : > { %218 = sbr.rel (%p2101_p8) target bundleno = 472 (0x1d8), region = 36 }
  0x63   : > { %1333 = dma.done.wait (%p2102_p1), [#allocation6], 16   ;;  %p2103_p5 = pmov %p2102_p1 }
  0x64   : > { %s1569_s11 = sand.u32 1, %s1354_s18   ;;  %p2104_p13 = scmp.ne.s32.totalorder %s2095_s27, 0 }
  0x65   : > { %1335 = vsyncadd (%p2103_p5), [#allocation6], 4294967280  ;;  %s1090_s13 = sshll.u32 %s1569_s11, 6  ;;  %s225_s21 = scalar_lea.sflag [#allocation4], %s1569_s11 }
  0x66   : > { %s1573_s10 = scalar_lea.vmem [#allocation7], %s1090_s13 }
  0x67   : > { %1337 = dma.done.wait (%p2104_p13), %s225_s21, 1024  }
  0x68   : > { %1339 = vsyncadd (%p2104_p13), %s225_s21, 4294966272  ;;  %s1091_s30 = sshll.u32 %s1569_s11, 3  ;;  %s234_s12 = scalar_lea.sflag [#allocation9], %s1569_s11 }
  0x69   : > { %s1581_s14 = scalar_lea.vmem [#allocation8], %s1091_s30 }
  0x6a   : > { %1341 = dma.done.wait (%p2104_p13), %s234_s12, 128  }
  0x6b   : > { %1343 = vsyncadd (%p2104_p13), %s234_s12, 4294967168 }
  0x6c   : > { %242 = sfence }
  0x6d   : > { %v1588_v0 = vld [vmem:[%s1573_s10] sm:$0xff]  ;;  %s1369_s15 = smov 127   ;;  %s1370_s16 = smov 1   ;;  %v1595_v1 = vld [vmem:[%s1573_s10 + $0x8] sm:$0xff]  ;;  %vm298_vm0 = vcmask 1040384   ;;  %v1606_v6 = vld [vmem:[%s1573_s10 + $0x10] sm:$0xff] }
  0x6e   : > { %287 = vrot.lane.b32.xlu1 %v1588_v0, %s1369_s15  ;;  %278 = vrot.lane.b32.xlu0 %v1588_v0, %s1370_s16  ;;  %v312_v2 = vrot.slane %v1595_v1, 7  ;;  %v368_v3 = vrot.slane %v1588_v0, 1  ;;  %v369_v4 = vrot.slane %v1595_v1, 1  ;;  %v311_v5 = vrot.slane %v1588_v0, 7  ;;  %v1609_v7 = vld [vmem:[%s1573_s10 + $0x18] sm:$0xff]  ;;  %v1634_v14 = vld [vmem:[%s1573_s10 + $0x20] sm:$0xff] }
  0x6f   : > { %vm355_vm1 = vcmask 1046528   ;;  %v480_v10 = vrot.slane %v1606_v6, 1  ;;  %v425_v11 = vrot.slane %v1609_v7, 7  ;;  %v481_v12 = vrot.slane %v1609_v7, 1  ;;  %v1637_v15 = vld [vmem:[%s1573_s10 + $0x28] sm:$0xff]  ;;  %v1658_v18 = vld [vmem:[%s1573_s10 + $0x30] sm:$0xff] }
  0x70   : > { %v1614_v8 = vsel %vm298_vm0, %v311_v5, %v312_v2  ;;  %v1619_v9 = vsel %vm355_vm1, %v368_v3, %v369_v4  ;;  %v424_v13 = vrot.slane %v1606_v6, 7  ;;  %v1661_v19 = vld [vmem:[%s1573_s10 + $0x38] sm:$0xff]  ;;  %v592_v20 = vrot.slane %v1634_v14, 1  ;;  %v824_v32 = vld [vmem:[%s1581_s14] sm:$0xff]  ;;  %s1371_s27 = smov 2   ;;  %s1372_s24 = smov 3  }
  0x71   : > { %v1647_v17 = vsel %vm355_vm1, %v480_v10, %v481_v12  ;;  %v537_v21 = vrot.slane %v1637_v15, 7  ;;  %v593_v22 = vrot.slane %v1637_v15, 1  ;;  %v536_v23 = vrot.slane %v1634_v14, 7  ;;  %s1716_s26 = sld [smem:[#allocation3 + $0x1]]  ;;  %s1718_s23 = sld [smem:[#allocation3 + $0x2]] }
  0x72   : > { %289 = vrot.lane.b32.xlu1 %v1595_v1, %s1369_s15  ;;  %280 = vrot.lane.b32.xlu0 %v1595_v1, %s1370_s16  ;;  %v1642_v16 = vsel %vm298_vm0, %v424_v13, %v425_v11  ;;  %v704_v26 = vrot.slane %v1658_v18, 1  ;;  %v649_v27 = vrot.slane %v1661_v19, 7  ;;  %v705_v28 = vrot.slane %v1661_v19, 1  ;;  %s1720_s5 = sld [smem:[#allocation3]]  ;;  %s1722_s9 = sld [smem:[#allocation3 + $0x3]] }
  0x73   : > { %v1678_v24 = vsel %vm298_vm0, %v536_v23, %v537_v21  ;;  %v1683_v25 = vsel %vm355_vm1, %v592_v20, %v593_v22  ;;  %v648_v29 = vrot.slane %v1658_v18, 7  ;;  %v832_v33 = vrot.slane %v824_v32, 4  ;;  %s1724_s6 = sld [smem:[#allocation3 + $0x4]]  ;;  %s1726_s7 = sld [smem:[#allocation3 + $0x5]] }
  0x74   : > { %v1697_v31 = vsel %vm355_vm1, %v704_v26, %v705_v28  ;;  %v834_v34 = vrot.slane %v824_v32, 3  ;;  %v826_v35 = vrot.slane %v824_v32, 7  ;;  %v836_v36 = vrot.slane %v824_v32, 2  ;;  %s1732_s8 = sld [smem:[#allocation3 + $0x8]]  ;;  %s1741_s13 = sld [smem:[#allocation3 + $0x6]] }
  0x75   : > { %v1692_v30 = vsel %vm298_vm0, %v648_v29, %v649_v27  ;;  %vm841_vm2 = vcmask 1041408   ;;  %v828_v38 = vrot.slane %v824_v32, 6  ;;  %vm843_vm3 = vcmask 1042432   ;;  %s1743_s21 = sld [smem:[#allocation3 + $0x7]]  ;;  %s1751_s10 = sld [smem:[#allocation3 + $0x9]] }
  0x76   : > { %394 = vrot.lane.b32.xlu0 %v1606_v6, %s1370_s16  ;;  %396 = vrot.lane.b32.xlu1 %v1609_v7, %s1370_s16  ;;  %v852_v37 = vsel %vm298_vm0, %v832_v33, %v834_v34  ;;  %v840_v40 = vsel %vm298_vm0, %v824_v32, %v826_v35  ;;  %v838_v41 = vrot.slane %v824_v32, 1  ;;  %vm845_vm4 = vcmask 1043456   ;;  %s1763_s30 = sld [smem:[#allocation3 + $0xa]]  ;;  %s1779_s12 = sld [smem:[#allocation3 + $0xb]] }
  0x77   : > { %v853_v39 = vsel %vm841_vm2, %v852_v37, %v834_v34  ;;  %vm847_vm5 = vcmask 1044480   ;;  %v830_v43 = vrot.slane %v824_v32, 5  ;;  %v842_v44 = vsel %vm841_vm2, %v840_v40, %v826_v35  ;;  %s1790_s14 = sld [smem:[#allocation3 + $0xc]]  ;;  %p2105_p4 = scmp.ne.s32.totalorder %s2096_s28, 0 }
  0x78   : > { %v854_v42 = vsel %vm843_vm3, %v853_v39, %v836_v36  ;;  %vm849_vm6 = vcmask 1045504   ;;  %v844_v46 = vsel %vm843_vm3, %v842_v44, %v828_v38  ;;  %vm293_vm7 = vcmask 121856  }
  0x79   : > { %v855_v45 = vsel %vm845_vm4, %v854_v42, %v836_v36  ;;  %v846_v48 = vsel %vm845_vm4, %v844_v46, %v828_v38  ;;  %vm284_vm8 = vcmask 7168   ;;  %v318_v55 = vstv %s1716_s26  ;;  %s1804_s26 = sld [smem:[#allocation3 + $0x10]] }
  0x7a   : > { %402 = vrot.lane.b32.xlu0 %v1606_v6, %s1369_s15  ;;  %404 = vrot.lane.b32.xlu1 %v1609_v7, %s1369_s15  ;;  %v856_v47 = vsel %vm847_vm5, %v855_v45, %v838_v41  ;;  %v848_v50 = vsel %vm847_vm5, %v846_v48, %v830_v43  ;;  %v316_v57 = vsel %vm298_vm0, 0.0, %v311_v5  ;;  %v332_v60 = vstv %s1718_s23  ;;  %s1812_s23 = sld [smem:[#allocation3 + $0xe]] }
  0x7b   : > { %v857_v49 = vsel %vm849_vm6, %v856_v47, %v838_v41  ;;  %v850_v52 = vsel %vm849_vm6, %v848_v50, %v830_v43  ;;  %v306_v62 = vstv %s1720_s5  ;;  %v319_v2 = vmul.f32 %v318_v55, %v316_v57  ;;  %s1815_s5 = sld [smem:[#allocation3 + $0x11]] }
  0x7c   : > { %v1703_v51 = vsel %vm355_vm1, %v857_v49, %v824_v32  ;;  %v1708_v53 = vsel %vm355_vm1, %v850_v52, %v832_v33  ;;  %v338_v32 = vstv %s1722_s9  ;;  %v344_v33 = vstv %s1724_s6  ;;  %s1824_s9 = sld [smem:[#allocation3 + $0x12]]  ;;  %s1829_s6 = sld [smem:[#allocation3 + $0x13]] }
  0x7d   : > { %v350_v36 = vstv %s1726_s7  ;;  %v373_v38 = vsel %vm355_vm1, %v369_v4, 0.0  ;;  %v429_v39 = vsel %vm298_vm0, 0.0, %v424_v13  ;;  %v387_v40 = vstv %s1732_s8  ;;  %s1847_s7 = sld [smem:[#allocation3 + $0x14]]  ;;  %s1861_s8 = sld [smem:[#allocation3 + $0x15]] }
  0x7e   : > { %506 = vrot.lane.b32.xlu0 %v1634_v14, %s1370_s16  ;;  %508 = vrot.lane.b32.xlu1 %v1637_v15, %s1370_s16  ;;  %v320_v42 = vmul.f32 %v318_v55, %v1614_v8  ;;  %v345_v47 = vmul.f32 %v344_v33, %v1588_v0  ;;  %v346_v13 = vmul.f32 %v344_v33, %v1595_v1  ;;  %v363_v55 = vstv %s1741_s13  ;;  %s1869_s13 = sld [smem:[#allocation3 + $0x16]] }
  0x7f   : > { %vm911_vm11 = vcmask 15360   ;;  %vm914_vm12 = vcmask 23552   ;;  %vm917_vm13 = vcmask 31744   ;;  %vm920_vm14 = vcmask 39936  }
  0x80   : > { %vm929_vm2 = vcmask 64512   ;;  %vm932_vm3 = vcmask 72704   ;;  %vm935_vm4 = vcmask 80896   ;;  %vm938_vm5 = vcmask 89088  }
  0x81   : > { %vm941_vm6 = vcmask 97280  }
  0x82   : > { %514 = vrot.lane.b32.xlu0 %v1634_v14, %s1369_s15  ;;  %516 = vrot.lane.b32.xlu1 %v1637_v15, %s1369_s15 }
  0x86   : > { %618 = vrot.lane.b32.xlu0 %v1658_v18, %s1370_s16  ;;  %620 = vrot.lane.b32.xlu1 %v1661_v19, %s1370_s16 }
  0x8a   : > { %626 = vrot.lane.b32.xlu0 %v1658_v18, %s1369_s15  ;;  %628 = vrot.lane.b32.xlu1 %v1661_v19, %s1369_s15 }
  0x8e   : > { %863 = vrot.lane.b32.xlu1 %v1703_v51, %s1370_s16  ;;  %861 = vrot.lane.b32.xlu0 %v1708_v53, %s1370_s16 }
  0x92   : > { %869 = vrot.lane.b32.xlu1 %v1703_v51, %s1371_s27  ;;  %867 = vrot.lane.b32.xlu0 %v1708_v53, %s1371_s27  ;;  %s1796_s27 = sld [smem:[#allocation3 + $0xd]] }
  0x96   : > { %875 = vrot.lane.b32.xlu1 %v1703_v51, %s1372_s24  ;;  %873 = vrot.lane.b32.xlu0 %v1708_v53, %s1372_s24  ;;  %s1802_s24 = sld [smem:[#allocation3 + $0xf]] }
  0xe0   : > { %v288_v54 = vpop.permute.xlu1 %287  ;;  %v279_v56 = vpop.permute.xlu0 %278 }
  0xe1   : > { %v1735_v58 = vsel %vm293_vm7, %v288_v54, 0.0  ;;  %v285_v59 = vsel %vm284_vm8, 0.0, %v279_v56  ;;  %v375_v56 = vstv %s1743_s21  ;;  %s1875_s21 = sld [smem:[#allocation3 + $0x18]] }
  0xe2   : > { %v325_v61 = vrot.slane %v1735_v58, 7  ;;  %v299_v63 = vrot.slane %v285_v59, 7  ;;  %v339_v46 = vmul.f32 %v338_v32, %v285_v59  ;;  %v356_v49 = vrot.slane %v285_v59, 1 }
  0xe3   : > { %v351_v59 = vmul.f32 %v350_v36, %v1735_v58  ;;  %v376_v33 = vmul.f32 %v375_v56, %v1619_v9 }
  0xe4   : > { %v330_v3 = vsel %vm298_vm0, 0.0, %v325_v61  ;;  %v304_v5 = vsel %vm298_vm0, 0.0, %v299_v63  ;;  %v290_v10 = vpop.permute.xlu1 %289  ;;  %v281_v11 = vpop.permute.xlu0 %280 }
  0xe5   : > { %v333_v20 = vmul.f32 %v332_v60, %v330_v3  ;;  %v307_v21 = vmul.f32 %v306_v62, %v304_v5  ;;  %v1748_v26 = vsel %vm293_vm7, %v290_v10, 0.0  ;;  %v286_v27 = vsel %vm284_vm8, 0.0, %v281_v11 }
  0xe6   : > { %v326_v34 = vrot.slane %v1748_v26, 7  ;;  %v300_v35 = vrot.slane %v286_v27, 7  ;;  %v357_v43 = vrot.slane %v286_v27, 1  ;;  %v381_v8 = vrot.slane %v1748_v26, 1 }
  0xe7   : > { %v321_v37 = vadd.f32 %v319_v2, %v307_v21  ;;  %v419_v3 = vstv %s1751_s10  ;;  %v340_v10 = vmul.f32 %v338_v32, %v286_v27  ;;  %v352_v9 = vmul.f32 %v350_v36, %v1748_v26  ;;  %s1877_s10 = sld [smem:[#allocation3 + $0x19]] }
  0xe8   : > { %v301_v41 = vsel %vm298_vm0, %v299_v63, %v300_v35  ;;  %v395_v44 = vpop.permute.xlu0 %394  ;;  %v327_v4 = vsel %vm298_vm0, %v325_v61, %v326_v34  ;;  %v397_v48 = vpop.permute.xlu1 %396  ;;  %v358_v0 = vsel %vm355_vm1, %v356_v49, %v357_v43  ;;  %v431_v34 = vstv %s1763_s30  ;;  %s1883_s30 = sld [smem:[#allocation3 + $0x17]] }
  0xe9   : > { %v335_v45 = vadd.f32 %v333_v20, %v321_v37  ;;  %v308_v50 = vmul.f32 %v306_v62, %v301_v41  ;;  %v1772_v52 = vsel %vm284_vm8, 0.0, %v395_v44  ;;  %v334_v57 = vmul.f32 %v332_v60, %v327_v4 }
  0xea   : > { %v412_v61 = vrot.slane %v1772_v52, 7  ;;  %v380_v62 = vrot.slane %v1735_v58, 1  ;;  %v1785_v11 = vsel %vm284_vm8, 0.0, %v397_v48  ;;  %v364_v21 = vmul.f32 %v363_v55, %v358_v0 }
  0xeb   : > { %v341_v54 = vadd.f32 %v339_v46, %v335_v45  ;;  %v322_v63 = vadd.f32 %v320_v42, %v308_v50  ;;  %v361_v41 = vsel %vm355_vm1, %v357_v43, 0.0  ;;  %v413_v44 = vrot.slane %v1785_v11, 7 }
  0xec   : > { %v403_v1 = vpop.permute.xlu0 %402  ;;  %v405_v35 = vpop.permute.xlu1 %404  ;;  %v382_v58 = vsel %vm355_vm1, %v380_v62, %v381_v8  ;;  %v417_v27 = vsel %vm298_vm0, 0.0, %v412_v61  ;;  %v377_v45 = vmul.f32 %v375_v56, %v373_v38  ;;  %v432_v43 = vmul.f32 %v431_v34, %v429_v39 }
  0xed   : > { %v347_v2 = vadd.f32 %v345_v47, %v341_v54  ;;  %v336_v5 = vadd.f32 %v334_v57, %v322_v63  ;;  %v1788_v60 = vsel %vm293_vm7, %v403_v1, 0.0  ;;  %v1807_v47 = vsel %vm293_vm7, %v405_v35, 0.0 }
  0xee   : > { %v438_v32 = vrot.slane %v1788_v60, 7  ;;  %v388_v4 = vmul.f32 %v387_v40, %v382_v58  ;;  %v420_v49 = vmul.f32 %v419_v3, %v417_v27  ;;  %v365_v54 = vmul.f32 %v363_v55, %v361_v41 }
  0xef   : > { %v353_v20 = vadd.f32 %v351_v59, %v347_v2  ;;  %v342_v37 = vadd.f32 %v340_v10, %v336_v5  ;;  %v445_v57 = vstv %s1779_s12  ;;  %v385_v36 = vsel %vm355_vm1, %v381_v8, 0.0  ;;  %s1886_s12 = sld [smem:[#allocation3 + $0x1a]] }
  0xf0   : > { %v443_v26 = vsel %vm298_vm0, 0.0, %v438_v32  ;;  %v439_v56 = vrot.slane %v1807_v47, 7  ;;  %v507_v39 = vpop.permute.xlu0 %506  ;;  %v451_v0 = vstv %s1790_s14  ;;  %v389_v59 = vmul.f32 %v387_v40, %v385_v36  ;;  %v509_v41 = vpop.permute.xlu1 %508  ;;  %s1893_s14 = sld [smem:[#allocation3 + $0x1b]] }
  0xf1   : > { %v366_v42 = vadd.f32 %v364_v21, %v353_v20  ;;  %v348_v46 = vadd.f32 %v346_v13, %v342_v37  ;;  %v414_v13 = vsel %vm298_vm0, %v412_v61, %v413_v44  ;;  %v446_v1 = vmul.f32 %v445_v57, %v443_v26 }
  0xf2   : > { %v421_v2 = vmul.f32 %v419_v3, %v414_v13  ;;  %v457_v5 = vstv %s1796_s27  ;;  %v468_v8 = vrot.slane %v1772_v52, 1  ;;  %v469_v61 = vrot.slane %v1785_v11, 1  ;;  %s1898_s27 = sld [smem:[#allocation3 + $0x1c]] }
  0xf3   : > { %v378_v48 = vadd.f32 %v376_v33, %v366_v42  ;;  %v354_v50 = vadd.f32 %v352_v9, %v348_v46  ;;  %v440_v20 = vsel %vm298_vm0, %v438_v32, %v439_v56  ;;  %v475_v33 = vstv %s1802_s24  ;;  %s1916_s24 = sld [smem:[#allocation3 + $0x1d]] }
  0xf4   : > { %v433_v40 = vmul.f32 %v431_v34, %v1642_v16  ;;  %v487_v35 = vstv %s1804_s26  ;;  %v452_v3 = vmul.f32 %v451_v0, %v1772_v52  ;;  %v458_v58 = vmul.f32 %v457_v5, %v1606_v6  ;;  %s1930_s26 = sld [smem:[#allocation3 + $0x1e]] }
  0xf5   : > { %v390_v38 = vadd.f32 %v388_v4, %v378_v48  ;;  %v367_v63 = vadd.f32 %v365_v54, %v354_v50  ;;  %v1837_v27 = vsel %vm284_vm8, 0.0, %v507_v39  ;;  %v463_v44 = vstv %s1812_s23  ;;  %s1938_s23 = sld [smem:[#allocation3 + $0x1f]] }
  0xf6   : > { %v499_v9 = vstv %s1815_s5  ;;  %v447_v32 = vmul.f32 %v445_v57, %v440_v20  ;;  %v470_v46 = vsel %vm355_vm1, %v468_v8, %v469_v61  ;;  %v488_v16 = vmul.f32 %v487_v35, %v1647_v17  ;;  %s1948_s5 = sld [smem:[#allocation3 + $0x20]] }
  0xf7   : > { %v422_v55 = vadd.f32 %v420_v49, %v390_v38  ;;  %v379_v62 = vadd.f32 %v377_v45, %v367_v63  ;;  %v515_v45 = vpop.permute.xlu0 %514  ;;  %v459_v52 = vmul.f32 %v457_v5, %v1609_v7  ;;  %v492_v6 = vrot.slane %v1788_v60, 1 }
  0xf8   : > { %v493_v48 = vrot.slane %v1807_v47, 1  ;;  %v524_v49 = vrot.slane %v1837_v27, 7  ;;  %v464_v50 = vmul.f32 %v463_v44, %v1788_v60  ;;  %v485_v17 = vsel %vm355_vm1, %v481_v12, 0.0  ;;  %v517_v12 = vpop.permute.xlu1 %516 }
  0xf9   : > { %v434_v10 = vadd.f32 %v432_v43, %v422_v55  ;;  %v391_v21 = vadd.f32 %v389_v59, %v379_v62  ;;  %v1854_v54 = vsel %vm293_vm7, %v515_v45, 0.0  ;;  %v453_v57 = vmul.f32 %v451_v0, %v1785_v11 }
  0xfa   : > { %v531_v36 = vstv %s1824_s9  ;;  %v1859_v38 = vsel %vm284_vm8, 0.0, %v509_v41  ;;  %v476_v13 = vmul.f32 %v475_v33, %v470_v46  ;;  %v541_v7 = vsel %vm298_vm0, 0.0, %v536_v23  ;;  %s1952_s9 = sld [smem:[#allocation3 + $0x21]] }
  0xfb   : > { %v448_v37 = vadd.f32 %v446_v1, %v434_v10  ;;  %v423_v42 = vadd.f32 %v421_v2, %v391_v21  ;;  %v543_v60 = vstv %s1829_s6  ;;  %v494_v39 = vsel %vm355_vm1, %v492_v6, %v493_v48  ;;  %s1955_s6 = sld [smem:[#allocation3 + $0x22]] }
  0xfc   : > { %v529_v11 = vsel %vm298_vm0, 0.0, %v524_v49  ;;  %v550_v0 = vrot.slane %v1854_v54, 7  ;;  %v473_v55 = vsel %vm355_vm1, %v469_v61, 0.0  ;;  %v525_v59 = vrot.slane %v1859_v38, 7 }
  0xfd   : > { %v454_v34 = vadd.f32 %v452_v3, %v448_v37  ;;  %v435_v4 = vadd.f32 %v433_v40, %v423_v42  ;;  %v489_v62 = vmul.f32 %v487_v35, %v485_v17  ;;  %v465_v23 = vmul.f32 %v463_v44, %v1807_v47  ;;  %v619_v44 = vpop.permute.xlu0 %618 }
  0xfe   : > { %v1880_v5 = vsel %vm293_vm7, %v517_v12, 0.0  ;;  %v500_v10 = vmul.f32 %v499_v9, %v494_v39  ;;  %v532_v20 = vmul.f32 %v531_v36, %v529_v11  ;;  %v544_v21 = vmul.f32 %v543_v60, %v541_v7 }
  0xff   : > { %v460_v43 = vadd.f32 %v458_v58, %v454_v34  ;;  %v449_v26 = vadd.f32 %v447_v32, %v435_v4  ;;  %v477_v61 = vmul.f32 %v475_v33, %v473_v55  ;;  %v557_v3 = vstv %s1847_s7  ;;  %s1964_s7 = sld [smem:[#allocation3 + $0x23]] }
 0x100   : > { %v555_v47 = vsel %vm298_vm0, 0.0, %v550_v0  ;;  %v497_v35 = vsel %vm355_vm1, %v493_v48, 0.0  ;;  %v526_v37 = vsel %vm298_vm0, %v524_v49, %v525_v59  ;;  %v551_v41 = vrot.slane %v1880_v5, 7 }
 0x101   : > { %v466_v56 = vadd.f32 %v464_v50, %v460_v43  ;;  %v455_v63 = vadd.f32 %v453_v57, %v449_v26  ;;  %v563_v33 = vstv %s1861_s8  ;;  %v558_v45 = vmul.f32 %v557_v3, %v555_v47  ;;  %v627_v11 = vpop.permute.xlu0 %626  ;;  %s1973_s8 = sld [smem:[#allocation2]] }
 0x102   : > { %v533_v34 = vmul.f32 %v531_v36, %v526_v37  ;;  %v580_v6 = vrot.slane %v1837_v27, 1  ;;  %v581_v4 = vrot.slane %v1859_v38, 1  ;;  %v552_v49 = vsel %vm298_vm0, %v550_v0, %v551_v41 }
 0x103   : > { %v478_v1 = vadd.f32 %v476_v13, %v466_v56  ;;  %v461_v2 = vadd.f32 %v459_v52, %v455_v63  ;;  %v569_v52 = vstv %s1869_s13  ;;  %v587_v50 = vstv %s1875_s21  ;;  %v621_v56 = vpop.permute.xlu1 %620  ;;  %s1373_s13 = smov 4   ;;  %s1374_s21 = smov 5  }
 0x104   : > { %v545_v17 = vmul.f32 %v543_v60, %v1678_v24  ;;  %v564_v57 = vmul.f32 %v563_v33, %v1837_v27  ;;  %v570_v26 = vmul.f32 %v569_v52, %v1634_v14  ;;  %v1906_v13 = vsel %vm284_vm8, 0.0, %v619_v44 }
 0x105   : > { %v490_v8 = vadd.f32 %v488_v16, %v478_v1  ;;  %v467_v40 = vadd.f32 %v465_v23, %v461_v2  ;;  %v501_v16 = vmul.f32 %v499_v9, %v497_v35  ;;  %v599_v9 = vstv %s1877_s10  ;;  %s1375_s10 = smov 6  }
 0x106   : > { %v575_v12 = vstv %s1883_s30  ;;  %v611_v63 = vstv %s1886_s12  ;;  %v559_v39 = vmul.f32 %v557_v3, %v552_v49  ;;  %v582_v0 = vsel %vm355_vm1, %v580_v6, %v581_v4  ;;  %s1092_s30 = sshll.u32 %s1569_s11, 4 }
 0x107   : > { %v502_v58 = vadd.f32 %v500_v10, %v490_v8  ;;  %v479_v42 = vadd.f32 %v477_v61, %v467_v40  ;;  %v600_v24 = vmul.f32 %v599_v9, %v1683_v25  ;;  %v571_v27 = vmul.f32 %v569_v52, %v1637_v15  ;;  %s267_s12 = scalar_lea.vmem [#allocation10], %s1092_s30 }
 0x108   : > { %v604_v14 = vrot.slane %v1854_v54, 1  ;;  %v605_v1 = vrot.slane %v1880_v5, 1  ;;  %v636_v59 = vrot.slane %v1906_v13, 7  ;;  %v576_v2 = vmul.f32 %v575_v12, %v1854_v54 }
 0x109   : > { %v534_v32 = vadd.f32 %v532_v20, %v502_v58  ;;  %v491_v46 = vadd.f32 %v489_v62, %v479_v42  ;;  %v597_v25 = vsel %vm355_vm1, %v593_v22, 0.0  ;;  %v1923_v23 = vsel %vm293_vm7, %v627_v11, 0.0  ;;  %v629_v22 = vpop.permute.xlu1 %628 }
 0x10a   : > { %v565_v8 = vmul.f32 %v563_v33, %v1859_v38  ;;  %v643_v20 = vstv %s1893_s14  ;;  %v588_v61 = vmul.f32 %v587_v50, %v582_v0  ;;  %v653_v15 = vsel %vm298_vm0, 0.0, %v648_v29  ;;  %s971_s14 = sshll.u32 %s267_s12, 4  ;;  %s2035_s14 = int_to_ptr.vmem [resolvable:$true] %s971_s14 }
 0x10b   : > { %v546_v48 = vadd.f32 %v544_v21, %v534_v32  ;;  %v503_v43 = vadd.f32 %v501_v16, %v491_v46  ;;  %v1928_v21 = vsel %vm284_vm8, 0.0, %v621_v56  ;;  %v655_v54 = vstv %s1898_s27  ;;  %s1134_s27 = sshll.u32 %s1429_s1, 8 }
 0x10c   : > { %v606_v47 = vsel %vm355_vm1, %v604_v14, %v605_v1  ;;  %v641_v38 = vsel %vm298_vm0, 0.0, %v636_v59  ;;  %v662_v35 = vrot.slane %v1923_v23, 7  ;;  %v585_v58 = vsel %vm355_vm1, %v581_v4, 0.0 }
 0x10d   : > { %v560_v36 = vadd.f32 %v558_v45, %v546_v48  ;;  %v535_v7 = vadd.f32 %v533_v34, %v503_v43  ;;  %v637_v41 = vrot.slane %v1928_v21, 7  ;;  %v601_v42 = vmul.f32 %v599_v9, %v597_v25 }
 0x10e   : > { %v577_v29 = vmul.f32 %v575_v12, %v1880_v5  ;;  %v1945_v33 = vsel %vm293_vm7, %v629_v22, 0.0  ;;  %v612_v45 = vmul.f32 %v611_v63, %v606_v47  ;;  %v644_v46 = vmul.f32 %v643_v20, %v641_v38 }
 0x10f   : > { %v566_v60 = vadd.f32 %v564_v57, %v560_v36  ;;  %v547_v55 = vadd.f32 %v545_v17, %v535_v7  ;;  %v656_v16 = vmul.f32 %v655_v54, %v653_v15  ;;  %v589_v34 = vmul.f32 %v587_v50, %v585_v58 }
 0x110   : > { %v669_v6 = vstv %s1916_s24  ;;  %v667_v4 = vsel %vm298_vm0, 0.0, %v662_v35  ;;  %v609_v48 = vsel %vm355_vm1, %v605_v1, 0.0  ;;  %v638_v5 = vsel %vm298_vm0, %v636_v59, %v637_v41 }
 0x111   : > { %v572_v62 = vadd.f32 %v570_v26, %v566_v60  ;;  %v561_v10 = vadd.f32 %v559_v39, %v547_v55  ;;  %v663_v43 = vrot.slane %v1945_v33, 7  ;;  %v675_v50 = vstv %s1930_s26  ;;  %s2040_s26 = scalar_lea.hbm %s2089_s4, %s1134_s27 }
 0x112   : > { %v670_v57 = vmul.f32 %v669_v6, %v667_v4  ;;  %v613_v36 = vmul.f32 %v611_v63, %v609_v48  ;;  %v645_v56 = vmul.f32 %v643_v20, %v638_v5  ;;  %v681_v7 = vstv %s1938_s23  ;;  %s958_s23 = scalar_lea.sflag [#allocation5], %s1569_s11 }
 0x113   : > { %v578_v40 = vadd.f32 %v576_v2, %v572_v62  ;;  %v567_v3 = vadd.f32 %v565_v8, %v561_v10  ;;  %v664_v39 = vsel %vm298_vm0, %v662_v35, %v663_v43  ;;  %v692_v0 = vrot.slane %v1906_v13, 1 }
 0x114   : > { %v657_v60 = vmul.f32 %v655_v54, %v1692_v30  ;;  %v682_v63 = vmul.f32 %v681_v7, %v1658_v18  ;;  %v687_v1 = vstv %s1948_s5  ;;  %v671_v59 = vmul.f32 %v669_v6, %v664_v39  ;;  %s1288_s5 = scalar_lea.vmem %s2035_s14, 256 }
 0x115   : > { %v590_v37 = vadd.f32 %v588_v61, %v578_v40  ;;  %v573_v44 = vadd.f32 %v571_v27, %v567_v3  ;;  %v676_v27 = vmul.f32 %v675_v50, %v1906_v13  ;;  %v699_v62 = vstv %s1952_s9  ;;  %p1289_p3 = scmp.ne.s32.totalorder %s2035_s14, %s1288_s5  ;;  %s1378_s9 = smov [#allocation10]  }
 0x116   : > { %v711_v2 = vstv %s1955_s6  ;;  %v716_v10 = vrot.slane %v1923_v23, 1  ;;  %v717_v20 = vrot.slane %v1945_v33, 1  ;;  %v688_v18 = vmul.f32 %v687_v1, %v1923_v23  ;;  %s1292_s6 = sshll.u32 %s1378_s9, 4  ;;  %s1293_s6 = int_to_ptr.vmem [resolvable:$false] %s1292_s6 }
 0x117   : > { %v602_v32 = vadd.f32 %v600_v24, %v590_v37  ;;  %v579_v52 = vadd.f32 %v577_v29, %v573_v44  ;;  %v693_v24 = vrot.slane %v1928_v21, 1  ;;  %v677_v61 = vmul.f32 %v675_v50, %v1928_v21  ;;  %p1290_p11 = pnand %p1289_p3, %p2105_p4  ;;  %p1295_p2 = scmp.lt.s32.totalorder %s2035_s14, %s1293_s6 }
 0x118   : > { %v683_v40 = vmul.f32 %v681_v7, %v1661_v19  ;;  %v712_v22 = vmul.f32 %v711_v2, %v1697_v31  ;;  %v734_v47 = vlaneseq  ;;  %v723_v38 = vstv %s1964_s7  ;;  %s1294_s7 = scalar_lea.vmem %s1293_s6, 512 }
 0x119   : > { %v614_v49 = vadd.f32 %v612_v45, %v602_v32  ;;  %v591_v17 = vadd.f32 %v589_v34, %v579_v52  ;;  %v694_v8 = vsel %vm355_vm1, %v692_v0, %v693_v24  ;;  %v718_v58 = vsel %vm355_vm1, %v716_v10, %v717_v20  ;;  %p1291_p0 = pneg %p1290_p11  ;;  %p1296_p7 = scmp.lt.s32.totalorder %s1294_s7, %s1288_s5 }
 0x11a   : > { %v700_v54 = vmul.f32 %v699_v62, %v694_v8  ;;  %v697_v37 = vsel %vm355_vm1, %v693_v24, 0.0  ;;  %v709_v23 = vsel %vm355_vm1, %v705_v28, 0.0  ;;  %v724_v29 = vmul.f32 %v723_v38, %v718_v58 }
 0x11b   : > { %v646_v9 = vadd.f32 %v644_v46, %v614_v49  ;;  %v603_v26 = vadd.f32 %v601_v42, %v591_v17  ;;  %v689_v42 = vmul.f32 %v687_v1, %v1945_v33  ;;  %v735_v31 = vshrl.u32 %v734_v47, 7  ;;  %p1297_p6 = por %p1296_p7, %p1295_p2 }
 0x11c   : > { %v701_v32 = vmul.f32 %v699_v62, %v697_v37  ;;  %v713_v45 = vmul.f32 %v711_v2, %v709_v23  ;;  %v729_v46 = vstv %s1973_s8  ;;  %v721_v34 = vsel %vm355_vm1, %v717_v20, 0.0 }
 0x11d   : > { %v658_v12 = vadd.f32 %v656_v16, %v646_v9  ;;  %v615_v11 = vadd.f32 %v613_v36, %v603_v26  ;;  %v736_v48 = vadd.s32 8, %v735_v31  ;;  %v725_v49 = vmul.f32 %v723_v38, %v721_v34  ;;  %p1298_p12 = pnand %p1297_p6, %p1291_p0 }
 0x11e   : > { %v741_v17 = vand.u32 1, %v735_v31 }
 0x11f   : > { %v672_v14 = vadd.f32 %v670_v57, %v658_v12  ;;  %v647_v55 = vadd.f32 %v645_v56, %v615_v11  ;;  %v748_v33 = vand.u32 1, %v736_v48 }
 0x120   : > { %vm761_vm10 = vcmp.eq.s32.totalorder %v741_v17, 0 }
 0x121   : > { %v678_v25 = vadd.f32 %v676_v27, %v672_v14  ;;  %v659_v30 = vadd.f32 %v657_v60, %v647_v55  ;;  %vm762_vm9 = vcmp.eq.s32.totalorder %v748_v33, 0  ;;  %v864_v27 = vpop.permute.xlu1 %863 }
 0x122   : > { %v910_v1 = vsel %vm284_vm8, %v1703_v51, %v864_v27 }
 0x123   : > { %v684_v13 = vadd.f32 %v682_v63, %v678_v25  ;;  %v673_v15 = vadd.f32 %v671_v59, %v659_v30  ;;  %v862_v63 = vpop.permute.xlu0 %861  ;;  %v913_v62 = vsel %vm911_vm11, %v910_v1, %v864_v27  ;;  %v764_v25 = vand.u32 127, %v734_v47 }
 0x124   : > { %v909_v59 = vsel %vm284_vm8, %v1708_v53, %v862_v63 }
 0x125   : > { %v690_v3 = vadd.f32 %v688_v18, %v684_v13  ;;  %v679_v35 = vadd.f32 %v677_v61, %v673_v15  ;;  %v870_v14 = vpop.permute.xlu1 %869  ;;  %v912_v2 = vsel %vm911_vm11, %v909_v59, %v862_v63  ;;  %v769_v13 = vand.u32 1, %v764_v25 }
 0x126   : > { %v916_v30 = vsel %vm914_vm12, %v913_v62, %v870_v14 }
 0x127   : > { %v702_v41 = vadd.f32 %v700_v54, %v690_v3  ;;  %v685_v21 = vadd.f32 %v683_v40, %v679_v35  ;;  %v868_v55 = vpop.permute.xlu0 %867  ;;  %v919_v40 = vsel %vm917_vm13, %v916_v30, %v870_v14  ;;  %vm777_vm15 = vcmp.eq.s32.totalorder %v769_v13, 0 }
 0x128   : > { %v915_v20 = vsel %vm914_vm12, %v912_v2, %v868_v55 }
 0x129   : > { %v714_v44 = vadd.f32 %v712_v22, %v702_v41  ;;  %v691_v16 = vadd.f32 %v689_v42, %v685_v21  ;;  %v876_v8 = vpop.permute.xlu1 %875  ;;  %v918_v15 = vsel %vm917_vm13, %v915_v20, %v868_v55 }
 0x12b   : > { %v726_v52 = vadd.f32 %v724_v29, %v714_v44  ;;  %v703_v6 = vadd.f32 %v701_v32, %v691_v16  ;;  %v874_v10 = vpop.permute.xlu0 %873 }
 0x12d   : > { %v730_v4 = vadd.f32 %v729_v46, %v726_v52  ;;  %v715_v19 = vadd.f32 %v713_v45, %v703_v6 }
 0x12f   : > { %v727_v28 = vadd.f32 %v725_v49, %v715_v19  ;;  %v1990_v5 = vmax.f32 %v730_v4, 0.0 }
 0x131   : > { %v731_v43 = vadd.f32 %v729_v46, %v727_v28  ;;  %v786_v9 = vrot.slane %v1990_v5, 7  ;;  %v780_v36 = vrot.slane %v1990_v5, 1 }
 0x133   : > { %v1992_v50 = vmax.f32 %v731_v43, 0.0  ;;  %v791_v39 = vsel %vm298_vm0, 0.0, %v786_v9 }
 0x135   : > { %v781_v57 = vrot.slane %v1992_v50, 1  ;;  %v787_v26 = vrot.slane %v1992_v50, 7 }
 0x137   : > { %v785_v56 = vsel %vm355_vm1, %v781_v57, 0.0  ;;  %v788_v7 = vsel %vm298_vm0, %v786_v9, %v787_v26  ;;  %v782_v12 = vsel %vm355_vm1, %v780_v36, %v781_v57  ;;  %vm923_vm0 = vcmask 48128  }
 0x138   : > { %v793_v11 = vsel %vm762_vm9, %v785_v56, %v788_v7  ;;  %v792_v0 = vsel %vm761_vm10, %v782_v12, %v791_v39  ;;  %vm926_vm1 = vcmask 56320   ;;  %vm947_vm9 = vcmask 113664  }
 0x139   : > { %v795_v24 = vadd.f32 %v793_v11, %v1992_v50  ;;  %v794_v60 = vadd.f32 %v792_v0, %v1990_v5  ;;  %vm954_vm10 = vcmask 130048  }
 0x13b   : > { %800 = vrot.lane.b32.xlu1 %v795_v24, %s1369_s15  ;;  %798 = vrot.lane.b32.xlu0 %v794_v60, %s1369_s15  ;;  %s1376_s15 = smov 7  }
 0x13f   : > { %808 = vrot.lane.b32.xlu1 %v795_v24, %s1370_s16  ;;  %806 = vrot.lane.b32.xlu0 %v794_v60, %s1370_s16  ;;  %s1377_s16 = smov 8  }
 0x143   : > { %881 = vrot.lane.b32.xlu1 %v1703_v51, %s1373_s13  ;;  %879 = vrot.lane.b32.xlu0 %v1708_v53, %s1373_s13 }
 0x147   : > { %887 = vrot.lane.b32.xlu1 %v1703_v51, %s1374_s21  ;;  %885 = vrot.lane.b32.xlu0 %v1708_v53, %s1374_s21 }
 0x14b   : > { %893 = vrot.lane.b32.xlu1 %v1703_v51, %s1375_s10  ;;  %891 = vrot.lane.b32.xlu0 %v1708_v53, %s1375_s10 }
 0x14f   : > { %899 = vrot.lane.b32.xlu1 %v1703_v51, %s1376_s15  ;;  %897 = vrot.lane.b32.xlu0 %v1708_v53, %s1376_s15 }
 0x153   : > { %905 = vrot.lane.b32.xlu1 %v1703_v51, %s1377_s16  ;;  %903 = vrot.lane.b32.xlu0 %v1708_v53, %s1377_s16  ;;  %v922_v51 = vsel %vm920_vm14, %v919_v40, %v876_v8  ;;  %v921_v53 = vsel %vm920_vm14, %v918_v15, %v874_v10 }
 0x154   : > { %v925_v21 = vsel %vm923_vm0, %v922_v51, %v876_v8  ;;  %v924_v42 = vsel %vm923_vm0, %v921_v53, %v874_v10 }
 0x1ad   : > { %v801_v18 = vpop.permute.xlu1 %800  ;;  %v799_v61 = vpop.permute.xlu0 %798 }
 0x1ae   : > { %v805_v3 = vsel %vm293_vm7, %v801_v18, 0.0  ;;  %v804_v47 = vsel %vm293_vm7, %v799_v61, 0.0 }
 0x1b1   : > { %v809_v54 = vpop.permute.xlu1 %808  ;;  %v807_v22 = vpop.permute.xlu0 %806 }
 0x1b2   : > { %v813_v38 = vsel %vm284_vm8, 0.0, %v809_v54  ;;  %v812_v35 = vsel %vm284_vm8, 0.0, %v807_v22  ;;  %vm944_vm8 = vcmask 105472  }
 0x1b3   : > { %v815_v58 = vsel %vm777_vm15, %v805_v3, %v813_v38  ;;  %v814_v37 = vsel %vm777_vm15, %v804_v47, %v812_v35 }
 0x1b4   : > { %v817_v41 = vadd.f32 %v815_v58, %v795_v24  ;;  %v816_v23 = vadd.f32 %v814_v37, %v794_v60 }
 0x1b5   : > { %v882_v44 = vpop.permute.xlu1 %881  ;;  %v880_v29 = vpop.permute.xlu0 %879 }
 0x1b6   : > { %v819_v31 = vadd.f32 1e-05, %v817_v41  ;;  %v818_v32 = vadd.f32 1e-05, %v816_v23  ;;  %v928_v45 = vsel %vm926_vm1, %v925_v21, %v882_v44  ;;  %v927_v46 = vsel %vm926_vm1, %v924_v42, %v880_v29 }
 0x1b7   : > { %v931_v16 = vsel %vm929_vm2, %v928_v45, %v882_v44  ;;  %v930_v34 = vsel %vm929_vm2, %v927_v46, %v880_v29 }
 0x1b8   : > { %1209 = vrcp.f32 %v819_v31 }
 0x1b9   : > { %1211 = vrcp.f32 %v818_v32  ;;  %v888_v52 = vpop.permute.xlu1 %887  ;;  %v886_v6 = vpop.permute.xlu0 %885 }
 0x1ba   : > { %v934_v4 = vsel %vm932_vm3, %v931_v16, %v888_v52  ;;  %v933_v48 = vsel %vm932_vm3, %v930_v34, %v886_v6 }
 0x1bb   : > { %v937_v19 = vsel %vm935_vm4, %v934_v4, %v888_v52  ;;  %v936_v49 = vsel %vm935_vm4, %v933_v48, %v886_v6 }
 0x1bd   : > { %v894_v28 = vpop.permute.xlu1 %893  ;;  %v892_v33 = vpop.permute.xlu0 %891 }
 0x1be   : > { %v940_v43 = vsel %vm938_vm5, %v937_v19, %v894_v28  ;;  %v939_v17 = vsel %vm938_vm5, %v936_v49, %v892_v33 }
 0x1bf   : > { %v943_v9 = vsel %vm941_vm6, %v940_v43, %v894_v28  ;;  %v942_v57 = vsel %vm941_vm6, %v939_v17, %v892_v33 }
 0x1c1   : > { %v900_v26 = vpop.permute.xlu1 %899  ;;  %v898_v36 = vpop.permute.xlu0 %897 }
 0x1c2   : > { %v1210_v56 = vpop.eup %1209  ;;  %v946_v7 = vsel %vm944_vm8, %v943_v9, %v900_v26  ;;  %v945_v12 = vsel %vm944_vm8, %v942_v57, %v898_v36 }
 0x1c3   : > { %v1212_v39 = vpop.eup %1211  ;;  %v949_v11 = vsel %vm947_vm9, %v946_v7, %v900_v26  ;;  %v948_v0 = vsel %vm947_vm9, %v945_v12, %v898_v36  ;;  %v823_v24 = vmul.f32 %v1210_v56, %v1992_v50 }
 0x1c4   : > { %v821_v27 = vmul.f32 %v1212_v39, %v1990_v5 }
 0x1c5   : > { %v906_v60 = vpop.permute.xlu1 %905  ;;  %v904_v63 = vpop.permute.xlu0 %903 }
 0x1c6   : > { %v951_v14 = vsel %vm293_vm7, %v949_v11, %v906_v60  ;;  %v950_v55 = vsel %vm293_vm7, %v948_v0, %v904_v63 }
 0x1c7   : > { %v953_v1 = vmul.f32 %v951_v14, %v823_v24  ;;  %v952_v59 = vmul.f32 %v950_v55, %v821_v27 }
 0x1c9   : > { %956 = vst.msk [vmem:[%s267_s12 + $0x8] sm:$0xff] %vm954_vm10, %v953_v1  ;;  %955 = vst.msk [vmem:[%s267_s12] sm:$0xff] %vm954_vm10, %v952_v59 }
 0x1ca   : > { %1301 = shalt.err (!%p1298_p12)
}
 0x1cb   : > { %s1302_s8 = scalar_lea.hbm %s2040_s26, 256  ;;  %s1306_s10 = scalar_lea.hbm %s2089_s4, 512 }
 0x1cc   : > { %p1303_p9 = scmp.ne.s32.totalorder %s2040_s26, %s1302_s8  ;;  %p1307_p1 = scmp.lt.u32.totalorder %s2040_s26, %s2089_s4 }
 0x1cd   : > { %p1308_p5 = scmp.lt.u32.totalorder %s1306_s10, %s1302_s8  ;;  %p1310_p3 = scmp.lt.u32.totalorder %s1302_s8, %s2040_s26 }
 0x1ce   : > { %p1304_p10 = pnand %p1303_p9, %p2105_p4 }
 0x1cf   : > { %p1309_p13 = por %p1308_p5, %p1307_p1 }
 0x1d0   : > { %p1305_p8 = pneg %p1304_p10 }
 0x1d1   : > { %p1311_p11 = por %p1310_p3, %p1309_p13 }
 0x1d3   : > { %p1312_p0 = pnand %p1311_p11, %p1305_p8 }
 0x1d5   : > { %1315 = shalt.err (!%p1312_p0)
}
 0x1d6   : > { %s1379_s12 = smov 128  }
 0x1d7   : > { %1143 = dma.vmem_to_hbm [thread:$0]  (%p2105_p4), %s2035_s14, 256, %s2040_s26, %s958_s23, %s1379_s12, %s1379_s12, %s1377_s16  }
 0x1d8 PF: > { %s986_s27 = sand.u32 1, %s1350_s17   ;;  %p2106_p2 = scmp.ne.s32.totalorder %s2097_s29, 0 }
 0x1d9   : > { %p2107_p7 = scmp.ge.s32.totalorder %s1362_s20, 2  ;;  %s987_s1 = scalar_lea.sflag [#allocation5], %s986_s27 }
 0x1db   : > { %p1157_p6 = pnand %p2107_p7, %p2106_p2 }
 0x1dd   : > { %1345 = dma.done.wait (!%p1157_p6), %s987_s1, 256  }
 0x1de   : > { %1347 = vsyncadd (!%p1157_p6), %s987_s1, 4294967040  ;;  %p22_p12 = scmp.ge.s32.totalorder %s1433_s22, 4   ;;  %s2108_s17 = smov %s1354_s18 }
 0x1df   : > { %s2109_s18 = smov %s1358_s19  ;;  %s2110_s19 = smov %s1445_s25 }
 0x1e0   : > { %s2111_s20 = smov %s1433_s22  ;;  %24 = sbr.rel (!%p22_p12) target bundleno = 10 (0xa), region = 99 }
 0x1e7   :  { %992 = vsyncpa [#allocation4], 1 }
 0x1e8   :  { %994 = vsyncpa [#allocation4 + $0x1], 1 }
 0x1e9   :  { %995 = vsyncpa [#allocation9], 1 }
 0x1ea   :  { %997 = vsyncpa [#allocation9 + $0x1], 1 }
 0x1eb   :  { %998 = vsyncpa [#allocation5], 1 }
 0x1ec   :  { %1000 = vsyncpa [#allocation5 + $0x1], 1 }
 0x1ed   :  { %1001 = vsyncpa [#allocation6], 1 }
 0x1ee   :  { %1003 = vsyncpa [#allocation6 + $0x1], 1 }

</bundles_post_ra>
